<compile_context>
chip_gen: v5e
topology: v5e:2x2
jax: 0.10.0
libtpu: 0.0.40
codegen_flags: <defaults>
</compile_context>

<pallas_src>
import functools

import jax
import jax.numpy as jnp
from jax.experimental import pallas as pl
from jax.experimental.pallas import tpu as pltpu

_LANE = 128


def _round_up(n, m):
    return ((n + m - 1) // m) * m


def _cdiv(a, b):
    return -(-a // b)


def _make_lstm_kernel(T, H, L, Tc):
    """Fused multi-layer LSTM + FC head kernel.

    Kernel-side gate order is (i, f, o, g): the three sigmoid gates occupy
    lanes [0, 3H) (one consolidated sigmoid), the cell gate g lanes [3H, 4H).
    """
    n_chunks = T // Tc
    H3 = 3 * H

    def kernel(*refs):
        x_ref, mo_ref = refs[0], refs[1]
        layer_refs = refs[2:2 + 3 * L]
        wfc_ref, bfc_ref = refs[2 + 3 * L], refs[3 + 3 * L]
        o_ref = refs[4 + 3 * L]
        gch_ref = refs[5 + 3 * L]                      # (Tc, TB, 4H) gate chunk
        seq_ref = refs[6 + 3 * L] if L > 1 else None   # (T, TB, H) hidden seq

        TB = mo_ref.shape[0]

        def run_layer(fill_chunk, whh_v, write_seq):
            def chunk_body(ci, carry):
                base = ci * Tc
                fill_chunk(base)   # ih pre-activations + bias for [base, base+Tc)

                def step(tt, carry):
                    h, c = carry
                    pre = gch_ref[tt] + jnp.dot(
                        h, whh_v, preferred_element_type=jnp.float32)
                    # sigmoid(z) == 0.5 * tanh(0.5*z) + 0.5 : one EUP op for all
                    # three sigmoid gates, no exp / f32 divide on the chain.
                    sg = jnp.tanh(0.5 * pre[:, :H3]) * 0.5 + 0.5
                    g = jnp.tanh(pre[:, H3:])
                    c = sg[:, H:2 * H] * c + sg[:, :H] * g
                    h = sg[:, 2 * H:H3] * jnp.tanh(c)
                    if write_seq:                       # static python bool
                        seq_ref[base + tt] = h
                    return h, c

                # Fully unrolled (Tc <= 16): LLO can overlap step t+1's gate
                # load / elementwise under step t's dependent matmul + EUP.
                return jax.lax.fori_loop(0, Tc, step, carry, unroll=True)

            h0 = jnp.zeros((TB, H), jnp.float32)
            c0 = jnp.zeros((TB, H), jnp.float32)
            if n_chunks == 1:
                return chunk_body(0, (h0, c0))
            return jax.lax.fori_loop(0, n_chunks, chunk_body, (h0, c0))

        # ---- layer 0: input_size == 1 -> ih is a VPU broadcast multiply ----
        wih0 = layer_refs[0][...]      # (1, 4H)
        whh0 = layer_refs[1][...]      # (H, 4H)
        b0 = layer_refs[2][...]        # (1, 4H)

        def fill0(base):
            xm = x_ref[pl.ds(base, Tc)]                 # (Tc, TB, 1), mask folded
            gch_ref[...] = xm * wih0[None] + b0[None]   # -> (Tc, TB, 4H)

        h, c = run_layer(fill0, whh0, write_seq=(L > 1))

        # ---- layers 1..L-1: batched ih matmul per chunk (off the serial chain)
        for l in range(1, L):
            wih = layer_refs[3 * l][...]
            whh = layer_refs[3 * l + 1][...]
            b = layer_refs[3 * l + 2][...]

            def fill(base, wih=wih, b=b):
                # Chunk of the previous layer's output is read here BEFORE the
                # step loop overwrites those rows -> safe in-place reuse.
                sc = seq_ref[pl.ds(base, Tc)]           # (Tc, TB, H)
                g2d = jnp.dot(sc.reshape(Tc * TB, H), wih,
                              preferred_element_type=jnp.float32)
                gch_ref[...] = g2d.reshape(Tc, TB, 4 * H) + b[None]

            h, c = run_layer(fill, whh, write_seq=(l < L - 1))

        # ---- mask_out at the last timestep, then FC head ----
        h = h * mo_ref[...]
        out = jnp.dot(h, wfc_ref[...],
                      preferred_element_type=jnp.float32) + bfc_ref[...]
        o_ref[...] = out.astype(o_ref.dtype)

    return kernel


def _choose_tiling(B, T, H, C, L, param_bytes, tile_b):
    """Pick (TB, Tc, footprint): fit a conservative VMEM budget (sized for
    v7x's 64 MiB physical VMEM) and produce >= 2 grid steps when B >= 16 so
    the 'parallel' batch axis can be sharded across megacore TensorCores."""
    budget = 40 * 1024 * 1024
    chunk_budget = 4 * 1024 * 1024

    def pick_tc(tb):
        for tc in range(min(T, 16), 0, -1):
            if T % tc == 0 and tc * tb * _round_up(4 * H, _LANE) * 4 <= chunk_budget:
                return tc
        return 1

    def footprint(tb, tc):
        f = 2 * T * tb * _LANE * 4                        # x (minor dim 1 lane-padded)
        f += 2 * tb * _round_up(H, _LANE) * 4             # mask_out last step
        f += 2 * tb * _round_up(C, _LANE) * 4             # output
        f += 2 * param_bytes                              # weights (pipeline-buffered)
        if L > 1:
            f += T * tb * _round_up(H, _LANE) * 4         # hidden-seq scratch
        f += tc * tb * _round_up(4 * H, _LANE) * 4        # gate-chunk scratch
        f += 8 * tb * _round_up(4 * H, _LANE) * 4         # live step values / slack
        return f

    min_tiles = 2 if B >= 16 else 1
    n_tiles = max(_cdiv(B, tile_b), min_tiles)
    tb = max(8, _round_up(_cdiv(B, n_tiles), 8))          # avoids near-2x padding
    while tb > 8 and footprint(tb, pick_tc(tb)) > budget:
        tb = max(8, _round_up(tb // 2, 8))
    tc = pick_tc(tb)
    return tb, tc, footprint(tb, tc)


@functools.partial(jax.jit, static_argnames=("tile_b",))
def lstm_mc_forward(x, mask_in, mask_out, params, *, tile_b=512):
    """x: (B, T); mask_in: (B, T); mask_out: reshapable to (B, T, H);
    params = (layers, (w_fc, b_fc)), layers = ((w_ih, w_hh, b), ...) with
    w_ih (in, 4H), w_hh (H, 4H), b (1, 4H)  [transposed vs torch, biases summed,
    standard PyTorch gate order i, f, g, o]."""
    layers, (wfc, bfc) = params
    B, T = x.shape
    H = layers[0][1].shape[0]
    L = len(layers)
    C = wfc.shape[1]

    # Reorder gate columns (i, f, g, o) -> (i, f, o, g): sigmoid gates become a
    # contiguous 3H lane slab, tanh gate is last (single sigmoid / tanh call).
    def reorder(w):
        return jnp.concatenate(
            [w[..., :2 * H], w[..., 3 * H:4 * H], w[..., 2 * H:3 * H]], axis=-1)

    k_layers = tuple((reorder(wih), reorder(whh), reorder(b))
                     for (wih, whh, b) in layers)

    # Fold mask_in into x (fuses with the transpose below) and go time-major.
    x_t = jnp.transpose(x * mask_in)[:, :, None]          # (T, B, 1)
    # Only the last timestep of (out * mask_out) ever reaches the fc head.
    mo_last = mask_out.reshape(B, T, H)[:, -1, :]         # (B, H)

    param_bytes = 4 * (sum(w.size for lay in k_layers for w in lay)
                       + wfc.size + bfc.size)
    TB, Tc, fp = _choose_tiling(B, T, H, C, L, param_bytes, tile_b)

    B_pad = _round_up(B, TB)
    if B_pad != B:
        pad = B_pad - B
        x_t = jnp.pad(x_t, ((0, 0), (0, pad), (0, 0)))
        mo_last = jnp.pad(mo_last, ((0, pad), (0, 0)))

    grid = (B_pad // TB,)

    def const2(shape):
        return pl.BlockSpec(shape, lambda i: (0, 0))

    in_specs = [
        pl.BlockSpec((T, TB, 1), lambda i: (0, i, 0)),    # x * mask_in, time-major
        pl.BlockSpec((TB, H), lambda i: (i, 0)),          # mask_out[:, -1, :]
    ]
    flat_params = []
    for (wih, whh, b) in k_layers:
        in_specs += [const2(wih.shape), const2(whh.shape), const2(b.shape)]
        flat_params += [wih, whh, b]
    in_specs += [const2(wfc.shape), const2(bfc.shape)]
    flat_params += [wfc, bfc]

    out_spec = pl.BlockSpec((TB, C), lambda i: (i, 0))

    scratch = [pltpu.VMEM((Tc, TB, 4 * H), jnp.float32)]  # ih gate chunk
    if L > 1:
        # TODO(synk): optionally store as bfloat16 on v7x to double feasible TB.
        scratch.append(pltpu.VMEM((T, TB, H), jnp.float32))

    kernel = _make_lstm_kernel(T, H, L, Tc)

    # Advisory cost estimate for the XLA scheduler.
    flops = int(B_pad * T * (2 * L - 1) * 2 * H * 4 * H       # MXU matmuls
                + B_pad * 2 * H * C                           # fc head
                + B_pad * T * L * 12 * H)                     # gate elementwise
    transcendentals = int(B_pad * T * L * 5 * H)
    bytes_accessed = int(4 * (x_t.size + mo_last.size + B_pad * C
                              + sum(p.size for p in flat_params)))

    vmem_limit = min(max(int(fp * 1.25), 32 * 1024 * 1024), 64 * 1024 * 1024)

    out = pl.pallas_call(
        kernel,
        out_shape=jax.ShapeDtypeStruct((B_pad, C), jnp.float32),
        grid=grid,
        in_specs=in_specs,
        out_specs=out_spec,
        scratch_shapes=scratch,
        compiler_params=pltpu.CompilerParams(
            dimension_semantics=("parallel",),
            vmem_limit_bytes=vmem_limit),
        cost_estimate=pl.CostEstimate(
            flops=flops, transcendentals=transcendentals,
            bytes_accessed=bytes_accessed),
    )(x_t, mo_last, *flat_params)

    return out[:B]


def init_params(key, input_size, hidden_size, num_layers, num_classes):
    """PyTorch-style init: U(-1/sqrt(H), 1/sqrt(H)) for LSTM and the Linear.
    Weights stored transposed; the two LSTM biases are summed; standard
    PyTorch gate order (i, f, g, o)."""
    H = hidden_size
    bound = 1.0 / (H ** 0.5)
    layers = []
    for l in range(num_layers):
        in_f = input_size if l == 0 else H
        k1, k2, k3, k4 = jax.random.split(jax.random.fold_in(key, l), 4)
        wih = jax.random.uniform(k1, (in_f, 4 * H), jnp.float32, -bound, bound)
        whh = jax.random.uniform(k2, (H, 4 * H), jnp.float32, -bound, bound)
        b_ih = jax.random.uniform(k3, (1, 4 * H), jnp.float32, -bound, bound)
        b_hh = jax.random.uniform(k4, (1, 4 * H), jnp.float32, -bound, bound)
        layers.append((wih, whh, b_ih + b_hh))
    kw, kb = jax.random.split(jax.random.fold_in(key, 10_000))
    wfc = jax.random.uniform(kw, (H, num_classes), jnp.float32, -bound, bound)
    bfc = jax.random.uniform(kb, (1, num_classes), jnp.float32, -bound, bound)
    return tuple(layers), (wfc, bfc)


def lstm_mc_reference(x, mask_in, mask_out, params):
    """Pure-JAX mirror of the PyTorch forward (gate order i, f, g, o)."""
    layers, (wfc, bfc) = params
    B, T = x.shape
    H = layers[0][1].shape[0]

    seq = (x * mask_in)[:, :, None]                       # (B, T, 1)
    for (wih, whh, b) in layers:
        h = jnp.zeros((B, H), jnp.float32)
        c = jnp.zeros((B, H), jnp.float32)
        outs = []
        for t in range(T):
            pre = seq[:, t, :] @ wih + h @ whh + b
            i = jax.nn.sigmoid(pre[:, 0:H])
            f = jax.nn.sigmoid(pre[:, H:2 * H])
            g = jnp.tanh(pre[:, 2 * H:3 * H])
            o = jax.nn.sigmoid(pre[:, 3 * H:4 * H])
            c = f * c + i * g
            h = o * jnp.tanh(c)
            outs.append(h)
        seq = jnp.stack(outs, axis=1)                     # (B, T, H)
    out = seq * mask_out.reshape(seq.shape)
    return out[:, -1, :] @ wfc + bfc


if __name__ == "__main__":
    key = jax.random.PRNGKey(0)
    kx, kmi, kmo, kp = jax.random.split(key, 4)

    # Small shapes consistent with the module: input_size=1 (forced by the
    # reshape in forward), batch=8, seq=8, hidden=32, 2 layers, 4 classes.
    B, T, H, L, C = 8, 8, 32, 2, 4

    x = jax.random.normal(kx, (B, T), jnp.float32)
    mask_in = (jax.random.uniform(kmi, (B, T)) > 0.2).astype(jnp.float32)
    mask_out = (jax.random.uniform(kmo, (B, T, H)) > 0.2).astype(jnp.float32)
    params = init_params(kp, 1, H, L, C)

    out = lstm_mc_forward(x, mask_in, mask_out, params)
    out = jax.block_until_ready(out)

    ref = lstm_mc_reference(x, mask_in, mask_out, params)
    assert out.shape == (B, C), out.shape
    err = float(jnp.max(jnp.abs(out - ref)))
    assert jnp.allclose(out, ref, atol=1e-4, rtol=1e-4), f"max abs err = {err}"

    print("KERNEL_OK")
</pallas_src>

<mosaic_0001>
module attributes {stable_mosaic.version = 11 : i64} {
  func.func @kernel(%arg0: i32, %arg1: memref<8x8x1xf32, #tpu.memory_space<vmem>>, %arg2: memref<8x32xf32, #tpu.memory_space<vmem>>, %arg3: memref<1x128xf32, #tpu.memory_space<vmem>>, %arg4: memref<32x128xf32, #tpu.memory_space<vmem>>, %arg5: memref<1x128xf32, #tpu.memory_space<vmem>>, %arg6: memref<32x128xf32, #tpu.memory_space<vmem>>, %arg7: memref<32x128xf32, #tpu.memory_space<vmem>>, %arg8: memref<1x128xf32, #tpu.memory_space<vmem>>, %arg9: memref<32x4xf32, #tpu.memory_space<vmem>>, %arg10: memref<1x4xf32, #tpu.memory_space<vmem>>, %arg11: memref<8x4xf32, #tpu.memory_space<vmem>>, %arg12: memref<8x8x128xf32, #tpu.memory_space<vmem>>, %arg13: memref<8x8x32xf32, #tpu.memory_space<vmem>>) attributes {dimension_semantics = [#tpu.dimension_semantics<parallel>], iteration_bounds = array<i64: 1>, scalar_prefetch = 0 : i64, scratch_operands = 2 : i64, tpu.core_type = #tpu.core_type<tc>, window_params = [{transform_indices = @transform_0, window_bounds = array<i64: 8, 8, 1>}, {transform_indices = @transform_1, window_bounds = array<i64: 8, 32>}, {pipeline_mode = #tpu.pipeline_mode<synchronous>, transform_indices = @transform_2, window_bounds = array<i64: 1, 128>}, {pipeline_mode = #tpu.pipeline_mode<synchronous>, transform_indices = @transform_3, window_bounds = array<i64: 32, 128>}, {pipeline_mode = #tpu.pipeline_mode<synchronous>, transform_indices = @transform_4, window_bounds = array<i64: 1, 128>}, {pipeline_mode = #tpu.pipeline_mode<synchronous>, transform_indices = @transform_5, window_bounds = array<i64: 32, 128>}, {pipeline_mode = #tpu.pipeline_mode<synchronous>, transform_indices = @transform_6, window_bounds = array<i64: 32, 128>}, {pipeline_mode = #tpu.pipeline_mode<synchronous>, transform_indices = @transform_7, window_bounds = array<i64: 1, 128>}, {pipeline_mode = #tpu.pipeline_mode<synchronous>, transform_indices = @transform_8, window_bounds = array<i64: 32, 4>}, {pipeline_mode = #tpu.pipeline_mode<synchronous>, transform_indices = @transform_9, window_bounds = array<i64: 1, 4>}, {transform_indices = @transform_10, window_bounds = array<i64: 8, 4>}]} {
    %c0 = arith.constant 0 : index
    %c0_0 = arith.constant 0 : index
    %0 = vector.load %arg3[%c0, %c0_0] : memref<1x128xf32, #tpu.memory_space<vmem>>, vector<1x128xf32>
    %c0_1 = arith.constant 0 : index
    %c0_2 = arith.constant 0 : index
    %1 = vector.load %arg4[%c0_1, %c0_2] : memref<32x128xf32, #tpu.memory_space<vmem>>, vector<32x128xf32>
    %c0_3 = arith.constant 0 : index
    %c0_4 = arith.constant 0 : index
    %2 = vector.load %arg5[%c0_3, %c0_4] : memref<1x128xf32, #tpu.memory_space<vmem>>, vector<1x128xf32>
    %cst = arith.constant 0.000000e+00 : f32
    %3 = vector.broadcast %cst : f32 to vector<8x32xf32>
    %cst_5 = arith.constant 0.000000e+00 : f32
    %4 = vector.broadcast %cst_5 : f32 to vector<8x32xf32>
    %c0_6 = arith.constant 0 : index
    %c0_7 = arith.constant 0 : index
    %c0_8 = arith.constant 0 : index
    %5 = vector.load %arg1[%c0_6, %c0_7, %c0_8] : memref<8x8x1xf32, #tpu.memory_space<vmem>>, vector<8x8x1xf32>
    %6 = vector.shape_cast %0 : vector<1x128xf32> to vector<1x1x128xf32>
    %7 = vector.broadcast %5 : vector<8x8x1xf32> to vector<8x8x128xf32>
    %8 = vector.broadcast %6 : vector<1x1x128xf32> to vector<8x8x128xf32>
    %9 = arith.mulf %7, %8 : vector<8x8x128xf32>
    %10 = vector.shape_cast %2 : vector<1x128xf32> to vector<1x1x128xf32>
    %11 = vector.broadcast %10 : vector<1x1x128xf32> to vector<8x8x128xf32>
    %12 = arith.addf %9, %11 : vector<8x8x128xf32>
    %c0_9 = arith.constant 0 : index
    %c0_10 = arith.constant 0 : index
    %c0_11 = arith.constant 0 : index
    %13 = vector.load %arg12[%c0_9, %c0_10, %c0_11] : memref<8x8x128xf32, #tpu.memory_space<vmem>>, vector<8x8x128xf32>
    tpu.vector_store %arg12[%c0_9, %c0_10, %c0_11], %12 {strides = array<i32>} : memref<8x8x128xf32, #tpu.memory_space<vmem>>, vector<8x8x128xf32>,
    %c0_i32 = arith.constant 0 : i32
    %14 = arith.index_cast %c0_i32 : i32 to index
    %c0_12 = arith.constant 0 : index
    %c0_13 = arith.constant 0 : index
    %15 = vector.load %arg12[%14, %c0_12, %c0_13] : memref<8x8x128xf32, #tpu.memory_space<vmem>>, vector<1x8x128xf32>
    %16 = vector.shape_cast %15 : vector<1x8x128xf32> to vector<8x128xf32>
    %cst_14 = arith.constant dense<0.000000e+00> : vector<8x128xf32>
    %17 = tpu.matmul %3, %1, %cst_14 {dimension_numbers = #tpu.dot_dimension_numbers<[1], [0], [0], [1], [0, 0, 1, 1], [], []>} : vector<8x32xf32>, vector<32x128xf32>, vector<8x128xf32> -> vector<8x128xf32>
    %18 = arith.addf %16, %17 : vector<8x128xf32>
    %19 = vector.extract_strided_slice %18 {offsets = [0, 0], sizes = [8, 96], strides = [1, 1]} : vector<8x128xf32> to vector<8x96xf32>
    %cst_15 = arith.constant 5.000000e-01 : f32
    %20 = vector.broadcast %cst_15 : f32 to vector<8x96xf32>
    %21 = arith.mulf %20, %19 : vector<8x96xf32>
    %22 = math.tanh %21 : vector<8x96xf32>
    %cst_16 = arith.constant 5.000000e-01 : f32
    %23 = vector.broadcast %cst_16 : f32 to vector<8x96xf32>
    %24 = arith.mulf %22, %23 : vector<8x96xf32>
    %cst_17 = arith.constant 5.000000e-01 : f32
    %25 = vector.broadcast %cst_17 : f32 to vector<8x96xf32>
    %26 = arith.addf %24, %25 : vector<8x96xf32>
    %27 = vector.extract_strided_slice %18 {offsets = [0, 96], sizes = [8, 32], strides = [1, 1]} : vector<8x128xf32> to vector<8x32xf32>
    %28 = math.tanh %27 : vector<8x32xf32>
    %29 = vector.extract_strided_slice %26 {offsets = [0, 32], sizes = [8, 32], strides = [1, 1]} : vector<8x96xf32> to vector<8x32xf32>
    %30 = arith.mulf %29, %4 : vector<8x32xf32>
    %31 = vector.extract_strided_slice %26 {offsets = [0, 0], sizes = [8, 32], strides = [1, 1]} : vector<8x96xf32> to vector<8x32xf32>
    %32 = arith.mulf %31, %28 : vector<8x32xf32>
    %33 = arith.addf %30, %32 : vector<8x32xf32>
    %34 = vector.extract_strided_slice %26 {offsets = [0, 64], sizes = [8, 32], strides = [1, 1]} : vector<8x96xf32> to vector<8x32xf32>
    %35 = math.tanh %33 : vector<8x32xf32>
    %36 = arith.mulf %34, %35 : vector<8x32xf32>
    %c0_i32_18 = arith.constant 0 : i32
    %37 = arith.addi %c0_i32_18, %c0_i32 : i32
    %38 = arith.index_cast %37 : i32 to index
    %c0_19 = arith.constant 0 : index
    %c0_20 = arith.constant 0 : index
    %39 = vector.load %arg13[%38, %c0_19, %c0_20] : memref<8x8x32xf32, #tpu.memory_space<vmem>>, vector<1x8x32xf32>
    %40 = vector.shape_cast %39 : vector<1x8x32xf32> to vector<8x32xf32>
    %41 = vector.shape_cast %36 : vector<8x32xf32> to vector<1x8x32xf32>
    tpu.vector_store %arg13[%38, %c0_19, %c0_20], %41 {strides = array<i32>} : memref<8x8x32xf32, #tpu.memory_space<vmem>>, vector<1x8x32xf32>,
    %c1_i32 = arith.constant 1 : i32
    %42 = arith.index_cast %c1_i32 : i32 to index
    %c0_21 = arith.constant 0 : index
    %c0_22 = arith.constant 0 : index
    %43 = vector.load %arg12[%42, %c0_21, %c0_22] : memref<8x8x128xf32, #tpu.memory_space<vmem>>, vector<1x8x128xf32>
    %44 = vector.shape_cast %43 : vector<1x8x128xf32> to vector<8x128xf32>
    %cst_23 = arith.constant dense<0.000000e+00> : vector<8x128xf32>
    %45 = tpu.matmul %36, %1, %cst_23 {dimension_numbers = #tpu.dot_dimension_numbers<[1], [0], [0], [1], [0, 0, 1, 1], [], []>} : vector<8x32xf32>, vector<32x128xf32>, vector<8x128xf32> -> vector<8x128xf32>
    %46 = arith.addf %44, %45 : vector<8x128xf32>
    %47 = vector.extract_strided_slice %46 {offsets = [0, 0], sizes = [8, 96], strides = [1, 1]} : vector<8x128xf32> to vector<8x96xf32>
    %cst_24 = arith.constant 5.000000e-01 : f32
    %48 = vector.broadcast %cst_24 : f32 to vector<8x96xf32>
    %49 = arith.mulf %48, %47 : vector<8x96xf32>
    %50 = math.tanh %49 : vector<8x96xf32>
    %cst_25 = arith.constant 5.000000e-01 : f32
    %51 = vector.broadcast %cst_25 : f32 to vector<8x96xf32>
    %52 = arith.mulf %50, %51 : vector<8x96xf32>
    %cst_26 = arith.constant 5.000000e-01 : f32
    %53 = vector.broadcast %cst_26 : f32 to vector<8x96xf32>
    %54 = arith.addf %52, %53 : vector<8x96xf32>
    %55 = vector.extract_strided_slice %46 {offsets = [0, 96], sizes = [8, 32], strides = [1, 1]} : vector<8x128xf32> to vector<8x32xf32>
    %56 = math.tanh %55 : vector<8x32xf32>
    %57 = vector.extract_strided_slice %54 {offsets = [0, 32], sizes = [8, 32], strides = [1, 1]} : vector<8x96xf32> to vector<8x32xf32>
    %58 = arith.mulf %57, %33 : vector<8x32xf32>
    %59 = vector.extract_strided_slice %54 {offsets = [0, 0], sizes = [8, 32], strides = [1, 1]} : vector<8x96xf32> to vector<8x32xf32>
    %60 = arith.mulf %59, %56 : vector<8x32xf32>
    %61 = arith.addf %58, %60 : vector<8x32xf32>
    %62 = vector.extract_strided_slice %54 {offsets = [0, 64], sizes = [8, 32], strides = [1, 1]} : vector<8x96xf32> to vector<8x32xf32>
    %63 = math.tanh %61 : vector<8x32xf32>
    %64 = arith.mulf %62, %63 : vector<8x32xf32>
    %c0_i32_27 = arith.constant 0 : i32
    %65 = arith.addi %c0_i32_27, %c1_i32 : i32
    %66 = arith.index_cast %65 : i32 to index
    %c0_28 = arith.constant 0 : index
    %c0_29 = arith.constant 0 : index
    %67 = vector.load %arg13[%66, %c0_28, %c0_29] : memref<8x8x32xf32, #tpu.memory_space<vmem>>, vector<1x8x32xf32>
    %68 = vector.shape_cast %67 : vector<1x8x32xf32> to vector<8x32xf32>
    %69 = vector.shape_cast %64 : vector<8x32xf32> to vector<1x8x32xf32>
    tpu.vector_store %arg13[%66, %c0_28, %c0_29], %69 {strides = array<i32>} : memref<8x8x32xf32, #tpu.memory_space<vmem>>, vector<1x8x32xf32>,
    %c2_i32 = arith.constant 2 : i32
    %70 = arith.index_cast %c2_i32 : i32 to index
    %c0_30 = arith.constant 0 : index
    %c0_31 = arith.constant 0 : index
    %71 = vector.load %arg12[%70, %c0_30, %c0_31] : memref<8x8x128xf32, #tpu.memory_space<vmem>>, vector<1x8x128xf32>
    %72 = vector.shape_cast %71 : vector<1x8x128xf32> to vector<8x128xf32>
    %cst_32 = arith.constant dense<0.000000e+00> : vector<8x128xf32>
    %73 = tpu.matmul %64, %1, %cst_32 {dimension_numbers = #tpu.dot_dimension_numbers<[1], [0], [0], [1], [0, 0, 1, 1], [], []>} : vector<8x32xf32>, vector<32x128xf32>, vector<8x128xf32> -> vector<8x128xf32>
    %74 = arith.addf %72, %73 : vector<8x128xf32>
    %75 = vector.extract_strided_slice %74 {offsets = [0, 0], sizes = [8, 96], strides = [1, 1]} : vector<8x128xf32> to vector<8x96xf32>
    %cst_33 = arith.constant 5.000000e-01 : f32
    %76 = vector.broadcast %cst_33 : f32 to vector<8x96xf32>
    %77 = arith.mulf %76, %75 : vector<8x96xf32>
    %78 = math.tanh %77 : vector<8x96xf32>
    %cst_34 = arith.constant 5.000000e-01 : f32
    %79 = vector.broadcast %cst_34 : f32 to vector<8x96xf32>
    %80 = arith.mulf %78, %79 : vector<8x96xf32>
    %cst_35 = arith.constant 5.000000e-01 : f32
    %81 = vector.broadcast %cst_35 : f32 to vector<8x96xf32>
    %82 = arith.addf %80, %81 : vector<8x96xf32>
    %83 = vector.extract_strided_slice %74 {offsets = [0, 96], sizes = [8, 32], strides = [1, 1]} : vector<8x128xf32> to vector<8x32xf32>
    %84 = math.tanh %83 : vector<8x32xf32>
    %85 = vector.extract_strided_slice %82 {offsets = [0, 32], sizes = [8, 32], strides = [1, 1]} : vector<8x96xf32> to vector<8x32xf32>
    %86 = arith.mulf %85, %61 : vector<8x32xf32>
    %87 = vector.extract_strided_slice %82 {offsets = [0, 0], sizes = [8, 32], strides = [1, 1]} : vector<8x96xf32> to vector<8x32xf32>
    %88 = arith.mulf %87, %84 : vector<8x32xf32>
    %89 = arith.addf %86, %88 : vector<8x32xf32>
    %90 = vector.extract_strided_slice %82 {offsets = [0, 64], sizes = [8, 32], strides = [1, 1]} : vector<8x96xf32> to vector<8x32xf32>
    %91 = math.tanh %89 : vector<8x32xf32>
    %92 = arith.mulf %90, %91 : vector<8x32xf32>
    %c0_i32_36 = arith.constant 0 : i32
    %93 = arith.addi %c0_i32_36, %c2_i32 : i32
    %94 = arith.index_cast %93 : i32 to index
    %c0_37 = arith.constant 0 : index
    %c0_38 = arith.constant 0 : index
    %95 = vector.load %arg13[%94, %c0_37, %c0_38] : memref<8x8x32xf32, #tpu.memory_space<vmem>>, vector<1x8x32xf32>
    %96 = vector.shape_cast %95 : vector<1x8x32xf32> to vector<8x32xf32>
    %97 = vector.shape_cast %92 : vector<8x32xf32> to vector<1x8x32xf32>
    tpu.vector_store %arg13[%94, %c0_37, %c0_38], %97 {strides = array<i32>} : memref<8x8x32xf32, #tpu.memory_space<vmem>>, vector<1x8x32xf32>,
    %c3_i32 = arith.constant 3 : i32
    %98 = arith.index_cast %c3_i32 : i32 to index
    %c0_39 = arith.constant 0 : index
    %c0_40 = arith.constant 0 : index
    %99 = vector.load %arg12[%98, %c0_39, %c0_40] : memref<8x8x128xf32, #tpu.memory_space<vmem>>, vector<1x8x128xf32>
    %100 = vector.shape_cast %99 : vector<1x8x128xf32> to vector<8x128xf32>
    %cst_41 = arith.constant dense<0.000000e+00> : vector<8x128xf32>
    %101 = tpu.matmul %92, %1, %cst_41 {dimension_numbers = #tpu.dot_dimension_numbers<[1], [0], [0], [1], [0, 0, 1, 1], [], []>} : vector<8x32xf32>, vector<32x128xf32>, vector<8x128xf32> -> vector<8x128xf32>
    %102 = arith.addf %100, %101 : vector<8x128xf32>
    %103 = vector.extract_strided_slice %102 {offsets = [0, 0], sizes = [8, 96], strides = [1, 1]} : vector<8x128xf32> to vector<8x96xf32>
    %cst_42 = arith.constant 5.000000e-01 : f32
    %104 = vector.broadcast %cst_42 : f32 to vector<8x96xf32>
    %105 = arith.mulf %104, %103 : vector<8x96xf32>
    %106 = math.tanh %105 : vector<8x96xf32>
    %cst_43 = arith.constant 5.000000e-01 : f32
    %107 = vector.broadcast %cst_43 : f32 to vector<8x96xf32>
    %108 = arith.mulf %106, %107 : vector<8x96xf32>
    %cst_44 = arith.constant 5.000000e-01 : f32
    %109 = vector.broadcast %cst_44 : f32 to vector<8x96xf32>
    %110 = arith.addf %108, %109 : vector<8x96xf32>
    %111 = vector.extract_strided_slice %102 {offsets = [0, 96], sizes = [8, 32], strides = [1, 1]} : vector<8x128xf32> to vector<8x32xf32>
    %112 = math.tanh %111 : vector<8x32xf32>
    %113 = vector.extract_strided_slice %110 {offsets = [0, 32], sizes = [8, 32], strides = [1, 1]} : vector<8x96xf32> to vector<8x32xf32>
    %114 = arith.mulf %113, %89 : vector<8x32xf32>
    %115 = vector.extract_strided_slice %110 {offsets = [0, 0], sizes = [8, 32], strides = [1, 1]} : vector<8x96xf32> to vector<8x32xf32>
    %116 = arith.mulf %115, %112 : vector<8x32xf32>
    %117 = arith.addf %114, %116 : vector<8x32xf32>
    %118 = vector.extract_strided_slice %110 {offsets = [0, 64], sizes = [8, 32], strides = [1, 1]} : vector<8x96xf32> to vector<8x32xf32>
    %119 = math.tanh %117 : vector<8x32xf32>
    %120 = arith.mulf %118, %119 : vector<8x32xf32>
    %c0_i32_45 = arith.constant 0 : i32
    %121 = arith.addi %c0_i32_45, %c3_i32 : i32
    %122 = arith.index_cast %121 : i32 to index
    %c0_46 = arith.constant 0 : index
    %c0_47 = arith.constant 0 : index
    %123 = vector.load %arg13[%122, %c0_46, %c0_47] : memref<8x8x32xf32, #tpu.memory_space<vmem>>, vector<1x8x32xf32>
    %124 = vector.shape_cast %123 : vector<1x8x32xf32> to vector<8x32xf32>
    %125 = vector.shape_cast %120 : vector<8x32xf32> to vector<1x8x32xf32>
    tpu.vector_store %arg13[%122, %c0_46, %c0_47], %125 {strides = array<i32>} : memref<8x8x32xf32, #tpu.memory_space<vmem>>, vector<1x8x32xf32>,
    %c4_i32 = arith.constant 4 : i32
    %126 = arith.index_cast %c4_i32 : i32 to index
    %c0_48 = arith.constant 0 : index
    %c0_49 = arith.constant 0 : index
    %127 = vector.load %arg12[%126, %c0_48, %c0_49] : memref<8x8x128xf32, #tpu.memory_space<vmem>>, vector<1x8x128xf32>
    %128 = vector.shape_cast %127 : vector<1x8x128xf32> to vector<8x128xf32>
    %cst_50 = arith.constant dense<0.000000e+00> : vector<8x128xf32>
    %129 = tpu.matmul %120, %1, %cst_50 {dimension_numbers = #tpu.dot_dimension_numbers<[1], [0], [0], [1], [0, 0, 1, 1], [], []>} : vector<8x32xf32>, vector<32x128xf32>, vector<8x128xf32> -> vector<8x128xf32>
    %130 = arith.addf %128, %129 : vector<8x128xf32>
    %131 = vector.extract_strided_slice %130 {offsets = [0, 0], sizes = [8, 96], strides = [1, 1]} : vector<8x128xf32> to vector<8x96xf32>
    %cst_51 = arith.constant 5.000000e-01 : f32
    %132 = vector.broadcast %cst_51 : f32 to vector<8x96xf32>
    %133 = arith.mulf %132, %131 : vector<8x96xf32>
    %134 = math.tanh %133 : vector<8x96xf32>
    %cst_52 = arith.constant 5.000000e-01 : f32
    %135 = vector.broadcast %cst_52 : f32 to vector<8x96xf32>
    %136 = arith.mulf %134, %135 : vector<8x96xf32>
    %cst_53 = arith.constant 5.000000e-01 : f32
    %137 = vector.broadcast %cst_53 : f32 to vector<8x96xf32>
    %138 = arith.addf %136, %137 : vector<8x96xf32>
    %139 = vector.extract_strided_slice %130 {offsets = [0, 96], sizes = [8, 32], strides = [1, 1]} : vector<8x128xf32> to vector<8x32xf32>
    %140 = math.tanh %139 : vector<8x32xf32>
    %141 = vector.extract_strided_slice %138 {offsets = [0, 32], sizes = [8, 32], strides = [1, 1]} : vector<8x96xf32> to vector<8x32xf32>
    %142 = arith.mulf %141, %117 : vector<8x32xf32>
    %143 = vector.extract_strided_slice %138 {offsets = [0, 0], sizes = [8, 32], strides = [1, 1]} : vector<8x96xf32> to vector<8x32xf32>
    %144 = arith.mulf %143, %140 : vector<8x32xf32>
    %145 = arith.addf %142, %144 : vector<8x32xf32>
    %146 = vector.extract_strided_slice %138 {offsets = [0, 64], sizes = [8, 32], strides = [1, 1]} : vector<8x96xf32> to vector<8x32xf32>
    %147 = math.tanh %145 : vector<8x32xf32>
    %148 = arith.mulf %146, %147 : vector<8x32xf32>
    %c0_i32_54 = arith.constant 0 : i32
    %149 = arith.addi %c0_i32_54, %c4_i32 : i32
    %150 = arith.index_cast %149 : i32 to index
    %c0_55 = arith.constant 0 : index
    %c0_56 = arith.constant 0 : index
    %151 = vector.load %arg13[%150, %c0_55, %c0_56] : memref<8x8x32xf32, #tpu.memory_space<vmem>>, vector<1x8x32xf32>
    %152 = vector.shape_cast %151 : vector<1x8x32xf32> to vector<8x32xf32>
    %153 = vector.shape_cast %148 : vector<8x32xf32> to vector<1x8x32xf32>
    tpu.vector_store %arg13[%150, %c0_55, %c0_56], %153 {strides = array<i32>} : memref<8x8x32xf32, #tpu.memory_space<vmem>>, vector<1x8x32xf32>,
    %c5_i32 = arith.constant 5 : i32
    %154 = arith.index_cast %c5_i32 : i32 to index
    %c0_57 = arith.constant 0 : index
    %c0_58 = arith.constant 0 : index
    %155 = vector.load %arg12[%154, %c0_57, %c0_58] : memref<8x8x128xf32, #tpu.memory_space<vmem>>, vector<1x8x128xf32>
    %156 = vector.shape_cast %155 : vector<1x8x128xf32> to vector<8x128xf32>
    %cst_59 = arith.constant dense<0.000000e+00> : vector<8x128xf32>
    %157 = tpu.matmul %148, %1, %cst_59 {dimension_numbers = #tpu.dot_dimension_numbers<[1], [0], [0], [1], [0, 0, 1, 1], [], []>} : vector<8x32xf32>, vector<32x128xf32>, vector<8x128xf32> -> vector<8x128xf32>
    %158 = arith.addf %156, %157 : vector<8x128xf32>
    %159 = vector.extract_strided_slice %158 {offsets = [0, 0], sizes = [8, 96], strides = [1, 1]} : vector<8x128xf32> to vector<8x96xf32>
    %cst_60 = arith.constant 5.000000e-01 : f32
    %160 = vector.broadcast %cst_60 : f32 to vector<8x96xf32>
    %161 = arith.mulf %160, %159 : vector<8x96xf32>
    %162 = math.tanh %161 : vector<8x96xf32>
    %cst_61 = arith.constant 5.000000e-01 : f32
    %163 = vector.broadcast %cst_61 : f32 to vector<8x96xf32>
    %164 = arith.mulf %162, %163 : vector<8x96xf32>
    %cst_62 = arith.constant 5.000000e-01 : f32
    %165 = vector.broadcast %cst_62 : f32 to vector<8x96xf32>
    %166 = arith.addf %164, %165 : vector<8x96xf32>
    %167 = vector.extract_strided_slice %158 {offsets = [0, 96], sizes = [8, 32], strides = [1, 1]} : vector<8x128xf32> to vector<8x32xf32>
    %168 = math.tanh %167 : vector<8x32xf32>
    %169 = vector.extract_strided_slice %166 {offsets = [0, 32], sizes = [8, 32], strides = [1, 1]} : vector<8x96xf32> to vector<8x32xf32>
    %170 = arith.mulf %169, %145 : vector<8x32xf32>
    %171 = vector.extract_strided_slice %166 {offsets = [0, 0], sizes = [8, 32], strides = [1, 1]} : vector<8x96xf32> to vector<8x32xf32>
    %172 = arith.mulf %171, %168 : vector<8x32xf32>
    %173 = arith.addf %170, %172 : vector<8x32xf32>
    %174 = vector.extract_strided_slice %166 {offsets = [0, 64], sizes = [8, 32], strides = [1, 1]} : vector<8x96xf32> to vector<8x32xf32>
    %175 = math.tanh %173 : vector<8x32xf32>
    %176 = arith.mulf %174, %175 : vector<8x32xf32>
    %c0_i32_63 = arith.constant 0 : i32
    %177 = arith.addi %c0_i32_63, %c5_i32 : i32
    %178 = arith.index_cast %177 : i32 to index
    %c0_64 = arith.constant 0 : index
    %c0_65 = arith.constant 0 : index
    %179 = vector.load %arg13[%178, %c0_64, %c0_65] : memref<8x8x32xf32, #tpu.memory_space<vmem>>, vector<1x8x32xf32>
    %180 = vector.shape_cast %179 : vector<1x8x32xf32> to vector<8x32xf32>
    %181 = vector.shape_cast %176 : vector<8x32xf32> to vector<1x8x32xf32>
    tpu.vector_store %arg13[%178, %c0_64, %c0_65], %181 {strides = array<i32>} : memref<8x8x32xf32, #tpu.memory_space<vmem>>, vector<1x8x32xf32>,
    %c6_i32 = arith.constant 6 : i32
    %182 = arith.index_cast %c6_i32 : i32 to index
    %c0_66 = arith.constant 0 : index
    %c0_67 = arith.constant 0 : index
    %183 = vector.load %arg12[%182, %c0_66, %c0_67] : memref<8x8x128xf32, #tpu.memory_space<vmem>>, vector<1x8x128xf32>
    %184 = vector.shape_cast %183 : vector<1x8x128xf32> to vector<8x128xf32>
    %cst_68 = arith.constant dense<0.000000e+00> : vector<8x128xf32>
    %185 = tpu.matmul %176, %1, %cst_68 {dimension_numbers = #tpu.dot_dimension_numbers<[1], [0], [0], [1], [0, 0, 1, 1], [], []>} : vector<8x32xf32>, vector<32x128xf32>, vector<8x128xf32> -> vector<8x128xf32>
    %186 = arith.addf %184, %185 : vector<8x128xf32>
    %187 = vector.extract_strided_slice %186 {offsets = [0, 0], sizes = [8, 96], strides = [1, 1]} : vector<8x128xf32> to vector<8x96xf32>
    %cst_69 = arith.constant 5.000000e-01 : f32
    %188 = vector.broadcast %cst_69 : f32 to vector<8x96xf32>
    %189 = arith.mulf %188, %187 : vector<8x96xf32>
    %190 = math.tanh %189 : vector<8x96xf32>
    %cst_70 = arith.constant 5.000000e-01 : f32
    %191 = vector.broadcast %cst_70 : f32 to vector<8x96xf32>
    %192 = arith.mulf %190, %191 : vector<8x96xf32>
    %cst_71 = arith.constant 5.000000e-01 : f32
    %193 = vector.broadcast %cst_71 : f32 to vector<8x96xf32>
    %194 = arith.addf %192, %193 : vector<8x96xf32>
    %195 = vector.extract_strided_slice %186 {offsets = [0, 96], sizes = [8, 32], strides = [1, 1]} : vector<8x128xf32> to vector<8x32xf32>
    %196 = math.tanh %195 : vector<8x32xf32>
    %197 = vector.extract_strided_slice %194 {offsets = [0, 32], sizes = [8, 32], strides = [1, 1]} : vector<8x96xf32> to vector<8x32xf32>
    %198 = arith.mulf %197, %173 : vector<8x32xf32>
    %199 = vector.extract_strided_slice %194 {offsets = [0, 0], sizes = [8, 32], strides = [1, 1]} : vector<8x96xf32> to vector<8x32xf32>
    %200 = arith.mulf %199, %196 : vector<8x32xf32>
    %201 = arith.addf %198, %200 : vector<8x32xf32>
    %202 = vector.extract_strided_slice %194 {offsets = [0, 64], sizes = [8, 32], strides = [1, 1]} : vector<8x96xf32> to vector<8x32xf32>
    %203 = math.tanh %201 : vector<8x32xf32>
    %204 = arith.mulf %202, %203 : vector<8x32xf32>
    %c0_i32_72 = arith.constant 0 : i32
    %205 = arith.addi %c0_i32_72, %c6_i32 : i32
    %206 = arith.index_cast %205 : i32 to index
    %c0_73 = arith.constant 0 : index
    %c0_74 = arith.constant 0 : index
    %207 = vector.load %arg13[%206, %c0_73, %c0_74] : memref<8x8x32xf32, #tpu.memory_space<vmem>>, vector<1x8x32xf32>
    %208 = vector.shape_cast %207 : vector<1x8x32xf32> to vector<8x32xf32>
    %209 = vector.shape_cast %204 : vector<8x32xf32> to vector<1x8x32xf32>
    tpu.vector_store %arg13[%206, %c0_73, %c0_74], %209 {strides = array<i32>} : memref<8x8x32xf32, #tpu.memory_space<vmem>>, vector<1x8x32xf32>,
    %c7_i32 = arith.constant 7 : i32
    %210 = arith.index_cast %c7_i32 : i32 to index
    %c0_75 = arith.constant 0 : index
    %c0_76 = arith.constant 0 : index
    %211 = vector.load %arg12[%210, %c0_75, %c0_76] : memref<8x8x128xf32, #tpu.memory_space<vmem>>, vector<1x8x128xf32>
    %212 = vector.shape_cast %211 : vector<1x8x128xf32> to vector<8x128xf32>
    %cst_77 = arith.constant dense<0.000000e+00> : vector<8x128xf32>
    %213 = tpu.matmul %204, %1, %cst_77 {dimension_numbers = #tpu.dot_dimension_numbers<[1], [0], [0], [1], [0, 0, 1, 1], [], []>} : vector<8x32xf32>, vector<32x128xf32>, vector<8x128xf32> -> vector<8x128xf32>
    %214 = arith.addf %212, %213 : vector<8x128xf32>
    %215 = vector.extract_strided_slice %214 {offsets = [0, 0], sizes = [8, 96], strides = [1, 1]} : vector<8x128xf32> to vector<8x96xf32>
    %cst_78 = arith.constant 5.000000e-01 : f32
    %216 = vector.broadcast %cst_78 : f32 to vector<8x96xf32>
    %217 = arith.mulf %216, %215 : vector<8x96xf32>
    %218 = math.tanh %217 : vector<8x96xf32>
    %cst_79 = arith.constant 5.000000e-01 : f32
    %219 = vector.broadcast %cst_79 : f32 to vector<8x96xf32>
    %220 = arith.mulf %218, %219 : vector<8x96xf32>
    %cst_80 = arith.constant 5.000000e-01 : f32
    %221 = vector.broadcast %cst_80 : f32 to vector<8x96xf32>
    %222 = arith.addf %220, %221 : vector<8x96xf32>
    %223 = vector.extract_strided_slice %214 {offsets = [0, 96], sizes = [8, 32], strides = [1, 1]} : vector<8x128xf32> to vector<8x32xf32>
    %224 = math.tanh %223 : vector<8x32xf32>
    %225 = vector.extract_strided_slice %222 {offsets = [0, 32], sizes = [8, 32], strides = [1, 1]} : vector<8x96xf32> to vector<8x32xf32>
    %226 = arith.mulf %225, %201 : vector<8x32xf32>
    %227 = vector.extract_strided_slice %222 {offsets = [0, 0], sizes = [8, 32], strides = [1, 1]} : vector<8x96xf32> to vector<8x32xf32>
    %228 = arith.mulf %227, %224 : vector<8x32xf32>
    %229 = arith.addf %226, %228 : vector<8x32xf32>
    %230 = vector.extract_strided_slice %222 {offsets = [0, 64], sizes = [8, 32], strides = [1, 1]} : vector<8x96xf32> to vector<8x32xf32>
    %231 = math.tanh %229 : vector<8x32xf32>
    %232 = arith.mulf %230, %231 : vector<8x32xf32>
    %c0_i32_81 = arith.constant 0 : i32
    %233 = arith.addi %c0_i32_81, %c7_i32 : i32
    %234 = arith.index_cast %233 : i32 to index
    %c0_82 = arith.constant 0 : index
    %c0_83 = arith.constant 0 : index
    %235 = vector.load %arg13[%234, %c0_82, %c0_83] : memref<8x8x32xf32, #tpu.memory_space<vmem>>, vector<1x8x32xf32>
    %236 = vector.shape_cast %235 : vector<1x8x32xf32> to vector<8x32xf32>
    %237 = vector.shape_cast %232 : vector<8x32xf32> to vector<1x8x32xf32>
    tpu.vector_store %arg13[%234, %c0_82, %c0_83], %237 {strides = array<i32>} : memref<8x8x32xf32, #tpu.memory_space<vmem>>, vector<1x8x32xf32>,
    %c8_i32 = arith.constant 8 : i32
    %c0_84 = arith.constant 0 : index
    %c0_85 = arith.constant 0 : index
    %238 = vector.load %arg6[%c0_84, %c0_85] : memref<32x128xf32, #tpu.memory_space<vmem>>, vector<32x128xf32>
    %c0_86 = arith.constant 0 : index
    %c0_87 = arith.constant 0 : index
    %239 = vector.load %arg7[%c0_86, %c0_87] : memref<32x128xf32, #tpu.memory_space<vmem>>, vector<32x128xf32>
    %c0_88 = arith.constant 0 : index
    %c0_89 = arith.constant 0 : index
    %240 = vector.load %arg8[%c0_88, %c0_89] : memref<1x128xf32, #tpu.memory_space<vmem>>, vector<1x128xf32>
    %cst_90 = arith.constant 0.000000e+00 : f32
    %241 = vector.broadcast %cst_90 : f32 to vector<8x32xf32>
    %cst_91 = arith.constant 0.000000e+00 : f32
    %242 = vector.broadcast %cst_91 : f32 to vector<8x32xf32>
    %c0_92 = arith.constant 0 : index
    %c0_93 = arith.constant 0 : index
    %c0_94 = arith.constant 0 : index
    %243 = vector.load %arg13[%c0_92, %c0_93, %c0_94] : memref<8x8x32xf32, #tpu.memory_space<vmem>>, vector<8x8x32xf32>
    %244 = vector.shape_cast %243 : vector<8x8x32xf32> to vector<64x32xf32>
    %cst_95 = arith.constant dense<0.000000e+00> : vector<64x128xf32>
    %245 = tpu.matmul %244, %238, %cst_95 {dimension_numbers = #tpu.dot_dimension_numbers<[1], [0], [0], [1], [0, 0, 1, 1], [], []>} : vector<64x32xf32>, vector<32x128xf32>, vector<64x128xf32> -> vector<64x128xf32>
    %246 = vector.shape_cast %245 : vector<64x128xf32> to vector<8x8x128xf32>
    %247 = vector.shape_cast %240 : vector<1x128xf32> to vector<1x1x128xf32>
    %248 = vector.broadcast %247 : vector<1x1x128xf32> to vector<8x8x128xf32>
    %249 = arith.addf %246, %248 : vector<8x8x128xf32>
    %c0_96 = arith.constant 0 : index
    %c0_97 = arith.constant 0 : index
    %c0_98 = arith.constant 0 : index
    %250 = vector.load %arg12[%c0_96, %c0_97, %c0_98] : memref<8x8x128xf32, #tpu.memory_space<vmem>>, vector<8x8x128xf32>
    tpu.vector_store %arg12[%c0_96, %c0_97, %c0_98], %249 {strides = array<i32>} : memref<8x8x128xf32, #tpu.memory_space<vmem>>, vector<8x8x128xf32>,
    %c0_i32_99 = arith.constant 0 : i32
    %251 = arith.index_cast %c0_i32_99 : i32 to index
    %c0_100 = arith.constant 0 : index
    %c0_101 = arith.constant 0 : index
    %252 = vector.load %arg12[%251, %c0_100, %c0_101] : memref<8x8x128xf32, #tpu.memory_space<vmem>>, vector<1x8x128xf32>
    %253 = vector.shape_cast %252 : vector<1x8x128xf32> to vector<8x128xf32>
    %cst_102 = arith.constant dense<0.000000e+00> : vector<8x128xf32>
    %254 = tpu.matmul %241, %239, %cst_102 {dimension_numbers = #tpu.dot_dimension_numbers<[1], [0], [0], [1], [0, 0, 1, 1], [], []>} : vector<8x32xf32>, vector<32x128xf32>, vector<8x128xf32> -> vector<8x128xf32>
    %255 = arith.addf %253, %254 : vector<8x128xf32>
    %256 = vector.extract_strided_slice %255 {offsets = [0, 0], sizes = [8, 96], strides = [1, 1]} : vector<8x128xf32> to vector<8x96xf32>
    %cst_103 = arith.constant 5.000000e-01 : f32
    %257 = vector.broadcast %cst_103 : f32 to vector<8x96xf32>
    %258 = arith.mulf %257, %256 : vector<8x96xf32>
    %259 = math.tanh %258 : vector<8x96xf32>
    %cst_104 = arith.constant 5.000000e-01 : f32
    %260 = vector.broadcast %cst_104 : f32 to vector<8x96xf32>
    %261 = arith.mulf %259, %260 : vector<8x96xf32>
    %cst_105 = arith.constant 5.000000e-01 : f32
    %262 = vector.broadcast %cst_105 : f32 to vector<8x96xf32>
    %263 = arith.addf %261, %262 : vector<8x96xf32>
    %264 = vector.extract_strided_slice %255 {offsets = [0, 96], sizes = [8, 32], strides = [1, 1]} : vector<8x128xf32> to vector<8x32xf32>
    %265 = math.tanh %264 : vector<8x32xf32>
    %266 = vector.extract_strided_slice %263 {offsets = [0, 32], sizes = [8, 32], strides = [1, 1]} : vector<8x96xf32> to vector<8x32xf32>
    %267 = arith.mulf %266, %242 : vector<8x32xf32>
    %268 = vector.extract_strided_slice %263 {offsets = [0, 0], sizes = [8, 32], strides = [1, 1]} : vector<8x96xf32> to vector<8x32xf32>
    %269 = arith.mulf %268, %265 : vector<8x32xf32>
    %270 = arith.addf %267, %269 : vector<8x32xf32>
    %271 = vector.extract_strided_slice %263 {offsets = [0, 64], sizes = [8, 32], strides = [1, 1]} : vector<8x96xf32> to vector<8x32xf32>
    %272 = math.tanh %270 : vector<8x32xf32>
    %273 = arith.mulf %271, %272 : vector<8x32xf32>
    %c1_i32_106 = arith.constant 1 : i32
    %274 = arith.index_cast %c1_i32_106 : i32 to index
    %c0_107 = arith.constant 0 : index
    %c0_108 = arith.constant 0 : index
    %275 = vector.load %arg12[%274, %c0_107, %c0_108] : memref<8x8x128xf32, #tpu.memory_space<vmem>>, vector<1x8x128xf32>
    %276 = vector.shape_cast %275 : vector<1x8x128xf32> to vector<8x128xf32>
    %cst_109 = arith.constant dense<0.000000e+00> : vector<8x128xf32>
    %277 = tpu.matmul %273, %239, %cst_109 {dimension_numbers = #tpu.dot_dimension_numbers<[1], [0], [0], [1], [0, 0, 1, 1], [], []>} : vector<8x32xf32>, vector<32x128xf32>, vector<8x128xf32> -> vector<8x128xf32>
    %278 = arith.addf %276, %277 : vector<8x128xf32>
    %279 = vector.extract_strided_slice %278 {offsets = [0, 0], sizes = [8, 96], strides = [1, 1]} : vector<8x128xf32> to vector<8x96xf32>
    %cst_110 = arith.constant 5.000000e-01 : f32
    %280 = vector.broadcast %cst_110 : f32 to vector<8x96xf32>
    %281 = arith.mulf %280, %279 : vector<8x96xf32>
    %282 = math.tanh %281 : vector<8x96xf32>
    %cst_111 = arith.constant 5.000000e-01 : f32
    %283 = vector.broadcast %cst_111 : f32 to vector<8x96xf32>
    %284 = arith.mulf %282, %283 : vector<8x96xf32>
    %cst_112 = arith.constant 5.000000e-01 : f32
    %285 = vector.broadcast %cst_112 : f32 to vector<8x96xf32>
    %286 = arith.addf %284, %285 : vector<8x96xf32>
    %287 = vector.extract_strided_slice %278 {offsets = [0, 96], sizes = [8, 32], strides = [1, 1]} : vector<8x128xf32> to vector<8x32xf32>
    %288 = math.tanh %287 : vector<8x32xf32>
    %289 = vector.extract_strided_slice %286 {offsets = [0, 32], sizes = [8, 32], strides = [1, 1]} : vector<8x96xf32> to vector<8x32xf32>
    %290 = arith.mulf %289, %270 : vector<8x32xf32>
    %291 = vector.extract_strided_slice %286 {offsets = [0, 0], sizes = [8, 32], strides = [1, 1]} : vector<8x96xf32> to vector<8x32xf32>
    %292 = arith.mulf %291, %288 : vector<8x32xf32>
    %293 = arith.addf %290, %292 : vector<8x32xf32>
    %294 = vector.extract_strided_slice %286 {offsets = [0, 64], sizes = [8, 32], strides = [1, 1]} : vector<8x96xf32> to vector<8x32xf32>
    %295 = math.tanh %293 : vector<8x32xf32>
    %296 = arith.mulf %294, %295 : vector<8x32xf32>
    %c2_i32_113 = arith.constant 2 : i32
    %297 = arith.index_cast %c2_i32_113 : i32 to index
    %c0_114 = arith.constant 0 : index
    %c0_115 = arith.constant 0 : index
    %298 = vector.load %arg12[%297, %c0_114, %c0_115] : memref<8x8x128xf32, #tpu.memory_space<vmem>>, vector<1x8x128xf32>
    %299 = vector.shape_cast %298 : vector<1x8x128xf32> to vector<8x128xf32>
    %cst_116 = arith.constant dense<0.000000e+00> : vector<8x128xf32>
    %300 = tpu.matmul %296, %239, %cst_116 {dimension_numbers = #tpu.dot_dimension_numbers<[1], [0], [0], [1], [0, 0, 1, 1], [], []>} : vector<8x32xf32>, vector<32x128xf32>, vector<8x128xf32> -> vector<8x128xf32>
    %301 = arith.addf %299, %300 : vector<8x128xf32>
    %302 = vector.extract_strided_slice %301 {offsets = [0, 0], sizes = [8, 96], strides = [1, 1]} : vector<8x128xf32> to vector<8x96xf32>
    %cst_117 = arith.constant 5.000000e-01 : f32
    %303 = vector.broadcast %cst_117 : f32 to vector<8x96xf32>
    %304 = arith.mulf %303, %302 : vector<8x96xf32>
    %305 = math.tanh %304 : vector<8x96xf32>
    %cst_118 = arith.constant 5.000000e-01 : f32
    %306 = vector.broadcast %cst_118 : f32 to vector<8x96xf32>
    %307 = arith.mulf %305, %306 : vector<8x96xf32>
    %cst_119 = arith.constant 5.000000e-01 : f32
    %308 = vector.broadcast %cst_119 : f32 to vector<8x96xf32>
    %309 = arith.addf %307, %308 : vector<8x96xf32>
    %310 = vector.extract_strided_slice %301 {offsets = [0, 96], sizes = [8, 32], strides = [1, 1]} : vector<8x128xf32> to vector<8x32xf32>
    %311 = math.tanh %310 : vector<8x32xf32>
    %312 = vector.extract_strided_slice %309 {offsets = [0, 32], sizes = [8, 32], strides = [1, 1]} : vector<8x96xf32> to vector<8x32xf32>
    %313 = arith.mulf %312, %293 : vector<8x32xf32>
    %314 = vector.extract_strided_slice %309 {offsets = [0, 0], sizes = [8, 32], strides = [1, 1]} : vector<8x96xf32> to vector<8x32xf32>
    %315 = arith.mulf %314, %311 : vector<8x32xf32>
    %316 = arith.addf %313, %315 : vector<8x32xf32>
    %317 = vector.extract_strided_slice %309 {offsets = [0, 64], sizes = [8, 32], strides = [1, 1]} : vector<8x96xf32> to vector<8x32xf32>
    %318 = math.tanh %316 : vector<8x32xf32>
    %319 = arith.mulf %317, %318 : vector<8x32xf32>
    %c3_i32_120 = arith.constant 3 : i32
    %320 = arith.index_cast %c3_i32_120 : i32 to index
    %c0_121 = arith.constant 0 : index
    %c0_122 = arith.constant 0 : index
    %321 = vector.load %arg12[%320, %c0_121, %c0_122] : memref<8x8x128xf32, #tpu.memory_space<vmem>>, vector<1x8x128xf32>
    %322 = vector.shape_cast %321 : vector<1x8x128xf32> to vector<8x128xf32>
    %cst_123 = arith.constant dense<0.000000e+00> : vector<8x128xf32>
    %323 = tpu.matmul %319, %239, %cst_123 {dimension_numbers = #tpu.dot_dimension_numbers<[1], [0], [0], [1], [0, 0, 1, 1], [], []>} : vector<8x32xf32>, vector<32x128xf32>, vector<8x128xf32> -> vector<8x128xf32>
    %324 = arith.addf %322, %323 : vector<8x128xf32>
    %325 = vector.extract_strided_slice %324 {offsets = [0, 0], sizes = [8, 96], strides = [1, 1]} : vector<8x128xf32> to vector<8x96xf32>
    %cst_124 = arith.constant 5.000000e-01 : f32
    %326 = vector.broadcast %cst_124 : f32 to vector<8x96xf32>
    %327 = arith.mulf %326, %325 : vector<8x96xf32>
    %328 = math.tanh %327 : vector<8x96xf32>
    %cst_125 = arith.constant 5.000000e-01 : f32
    %329 = vector.broadcast %cst_125 : f32 to vector<8x96xf32>
    %330 = arith.mulf %328, %329 : vector<8x96xf32>
    %cst_126 = arith.constant 5.000000e-01 : f32
    %331 = vector.broadcast %cst_126 : f32 to vector<8x96xf32>
    %332 = arith.addf %330, %331 : vector<8x96xf32>
    %333 = vector.extract_strided_slice %324 {offsets = [0, 96], sizes = [8, 32], strides = [1, 1]} : vector<8x128xf32> to vector<8x32xf32>
    %334 = math.tanh %333 : vector<8x32xf32>
    %335 = vector.extract_strided_slice %332 {offsets = [0, 32], sizes = [8, 32], strides = [1, 1]} : vector<8x96xf32> to vector<8x32xf32>
    %336 = arith.mulf %335, %316 : vector<8x32xf32>
    %337 = vector.extract_strided_slice %332 {offsets = [0, 0], sizes = [8, 32], strides = [1, 1]} : vector<8x96xf32> to vector<8x32xf32>
    %338 = arith.mulf %337, %334 : vector<8x32xf32>
    %339 = arith.addf %336, %338 : vector<8x32xf32>
    %340 = vector.extract_strided_slice %332 {offsets = [0, 64], sizes = [8, 32], strides = [1, 1]} : vector<8x96xf32> to vector<8x32xf32>
    %341 = math.tanh %339 : vector<8x32xf32>
    %342 = arith.mulf %340, %341 : vector<8x32xf32>
    %c4_i32_127 = arith.constant 4 : i32
    %343 = arith.index_cast %c4_i32_127 : i32 to index
    %c0_128 = arith.constant 0 : index
    %c0_129 = arith.constant 0 : index
    %344 = vector.load %arg12[%343, %c0_128, %c0_129] : memref<8x8x128xf32, #tpu.memory_space<vmem>>, vector<1x8x128xf32>
    %345 = vector.shape_cast %344 : vector<1x8x128xf32> to vector<8x128xf32>
    %cst_130 = arith.constant dense<0.000000e+00> : vector<8x128xf32>
    %346 = tpu.matmul %342, %239, %cst_130 {dimension_numbers = #tpu.dot_dimension_numbers<[1], [0], [0], [1], [0, 0, 1, 1], [], []>} : vector<8x32xf32>, vector<32x128xf32>, vector<8x128xf32> -> vector<8x128xf32>
    %347 = arith.addf %345, %346 : vector<8x128xf32>
    %348 = vector.extract_strided_slice %347 {offsets = [0, 0], sizes = [8, 96], strides = [1, 1]} : vector<8x128xf32> to vector<8x96xf32>
    %cst_131 = arith.constant 5.000000e-01 : f32
    %349 = vector.broadcast %cst_131 : f32 to vector<8x96xf32>
    %350 = arith.mulf %349, %348 : vector<8x96xf32>
    %351 = math.tanh %350 : vector<8x96xf32>
    %cst_132 = arith.constant 5.000000e-01 : f32
    %352 = vector.broadcast %cst_132 : f32 to vector<8x96xf32>
    %353 = arith.mulf %351, %352 : vector<8x96xf32>
    %cst_133 = arith.constant 5.000000e-01 : f32
    %354 = vector.broadcast %cst_133 : f32 to vector<8x96xf32>
    %355 = arith.addf %353, %354 : vector<8x96xf32>
    %356 = vector.extract_strided_slice %347 {offsets = [0, 96], sizes = [8, 32], strides = [1, 1]} : vector<8x128xf32> to vector<8x32xf32>
    %357 = math.tanh %356 : vector<8x32xf32>
    %358 = vector.extract_strided_slice %355 {offsets = [0, 32], sizes = [8, 32], strides = [1, 1]} : vector<8x96xf32> to vector<8x32xf32>
    %359 = arith.mulf %358, %339 : vector<8x32xf32>
    %360 = vector.extract_strided_slice %355 {offsets = [0, 0], sizes = [8, 32], strides = [1, 1]} : vector<8x96xf32> to vector<8x32xf32>
    %361 = arith.mulf %360, %357 : vector<8x32xf32>
    %362 = arith.addf %359, %361 : vector<8x32xf32>
    %363 = vector.extract_strided_slice %355 {offsets = [0, 64], sizes = [8, 32], strides = [1, 1]} : vector<8x96xf32> to vector<8x32xf32>
    %364 = math.tanh %362 : vector<8x32xf32>
    %365 = arith.mulf %363, %364 : vector<8x32xf32>
    %c5_i32_134 = arith.constant 5 : i32
    %366 = arith.index_cast %c5_i32_134 : i32 to index
    %c0_135 = arith.constant 0 : index
    %c0_136 = arith.constant 0 : index
    %367 = vector.load %arg12[%366, %c0_135, %c0_136] : memref<8x8x128xf32, #tpu.memory_space<vmem>>, vector<1x8x128xf32>
    %368 = vector.shape_cast %367 : vector<1x8x128xf32> to vector<8x128xf32>
    %cst_137 = arith.constant dense<0.000000e+00> : vector<8x128xf32>
    %369 = tpu.matmul %365, %239, %cst_137 {dimension_numbers = #tpu.dot_dimension_numbers<[1], [0], [0], [1], [0, 0, 1, 1], [], []>} : vector<8x32xf32>, vector<32x128xf32>, vector<8x128xf32> -> vector<8x128xf32>
    %370 = arith.addf %368, %369 : vector<8x128xf32>
    %371 = vector.extract_strided_slice %370 {offsets = [0, 0], sizes = [8, 96], strides = [1, 1]} : vector<8x128xf32> to vector<8x96xf32>
    %cst_138 = arith.constant 5.000000e-01 : f32
    %372 = vector.broadcast %cst_138 : f32 to vector<8x96xf32>
    %373 = arith.mulf %372, %371 : vector<8x96xf32>
    %374 = math.tanh %373 : vector<8x96xf32>
    %cst_139 = arith.constant 5.000000e-01 : f32
    %375 = vector.broadcast %cst_139 : f32 to vector<8x96xf32>
    %376 = arith.mulf %374, %375 : vector<8x96xf32>
    %cst_140 = arith.constant 5.000000e-01 : f32
    %377 = vector.broadcast %cst_140 : f32 to vector<8x96xf32>
    %378 = arith.addf %376, %377 : vector<8x96xf32>
    %379 = vector.extract_strided_slice %370 {offsets = [0, 96], sizes = [8, 32], strides = [1, 1]} : vector<8x128xf32> to vector<8x32xf32>
    %380 = math.tanh %379 : vector<8x32xf32>
    %381 = vector.extract_strided_slice %378 {offsets = [0, 32], sizes = [8, 32], strides = [1, 1]} : vector<8x96xf32> to vector<8x32xf32>
    %382 = arith.mulf %381, %362 : vector<8x32xf32>
    %383 = vector.extract_strided_slice %378 {offsets = [0, 0], sizes = [8, 32], strides = [1, 1]} : vector<8x96xf32> to vector<8x32xf32>
    %384 = arith.mulf %383, %380 : vector<8x32xf32>
    %385 = arith.addf %382, %384 : vector<8x32xf32>
    %386 = vector.extract_strided_slice %378 {offsets = [0, 64], sizes = [8, 32], strides = [1, 1]} : vector<8x96xf32> to vector<8x32xf32>
    %387 = math.tanh %385 : vector<8x32xf32>
    %388 = arith.mulf %386, %387 : vector<8x32xf32>
    %c6_i32_141 = arith.constant 6 : i32
    %389 = arith.index_cast %c6_i32_141 : i32 to index
    %c0_142 = arith.constant 0 : index
    %c0_143 = arith.constant 0 : index
    %390 = vector.load %arg12[%389, %c0_142, %c0_143] : memref<8x8x128xf32, #tpu.memory_space<vmem>>, vector<1x8x128xf32>
    %391 = vector.shape_cast %390 : vector<1x8x128xf32> to vector<8x128xf32>
    %cst_144 = arith.constant dense<0.000000e+00> : vector<8x128xf32>
    %392 = tpu.matmul %388, %239, %cst_144 {dimension_numbers = #tpu.dot_dimension_numbers<[1], [0], [0], [1], [0, 0, 1, 1], [], []>} : vector<8x32xf32>, vector<32x128xf32>, vector<8x128xf32> -> vector<8x128xf32>
    %393 = arith.addf %391, %392 : vector<8x128xf32>
    %394 = vector.extract_strided_slice %393 {offsets = [0, 0], sizes = [8, 96], strides = [1, 1]} : vector<8x128xf32> to vector<8x96xf32>
    %cst_145 = arith.constant 5.000000e-01 : f32
    %395 = vector.broadcast %cst_145 : f32 to vector<8x96xf32>
    %396 = arith.mulf %395, %394 : vector<8x96xf32>
    %397 = math.tanh %396 : vector<8x96xf32>
    %cst_146 = arith.constant 5.000000e-01 : f32
    %398 = vector.broadcast %cst_146 : f32 to vector<8x96xf32>
    %399 = arith.mulf %397, %398 : vector<8x96xf32>
    %cst_147 = arith.constant 5.000000e-01 : f32
    %400 = vector.broadcast %cst_147 : f32 to vector<8x96xf32>
    %401 = arith.addf %399, %400 : vector<8x96xf32>
    %402 = vector.extract_strided_slice %393 {offsets = [0, 96], sizes = [8, 32], strides = [1, 1]} : vector<8x128xf32> to vector<8x32xf32>
    %403 = math.tanh %402 : vector<8x32xf32>
    %404 = vector.extract_strided_slice %401 {offsets = [0, 32], sizes = [8, 32], strides = [1, 1]} : vector<8x96xf32> to vector<8x32xf32>
    %405 = arith.mulf %404, %385 : vector<8x32xf32>
    %406 = vector.extract_strided_slice %401 {offsets = [0, 0], sizes = [8, 32], strides = [1, 1]} : vector<8x96xf32> to vector<8x32xf32>
    %407 = arith.mulf %406, %403 : vector<8x32xf32>
    %408 = arith.addf %405, %407 : vector<8x32xf32>
    %409 = vector.extract_strided_slice %401 {offsets = [0, 64], sizes = [8, 32], strides = [1, 1]} : vector<8x96xf32> to vector<8x32xf32>
    %410 = math.tanh %408 : vector<8x32xf32>
    %411 = arith.mulf %409, %410 : vector<8x32xf32>
    %c7_i32_148 = arith.constant 7 : i32
    %412 = arith.index_cast %c7_i32_148 : i32 to index
    %c0_149 = arith.constant 0 : index
    %c0_150 = arith.constant 0 : index
    %413 = vector.load %arg12[%412, %c0_149, %c0_150] : memref<8x8x128xf32, #tpu.memory_space<vmem>>, vector<1x8x128xf32>
    %414 = vector.shape_cast %413 : vector<1x8x128xf32> to vector<8x128xf32>
    %cst_151 = arith.constant dense<0.000000e+00> : vector<8x128xf32>
    %415 = tpu.matmul %411, %239, %cst_151 {dimension_numbers = #tpu.dot_dimension_numbers<[1], [0], [0], [1], [0, 0, 1, 1], [], []>} : vector<8x32xf32>, vector<32x128xf32>, vector<8x128xf32> -> vector<8x128xf32>
    %416 = arith.addf %414, %415 : vector<8x128xf32>
    %417 = vector.extract_strided_slice %416 {offsets = [0, 0], sizes = [8, 96], strides = [1, 1]} : vector<8x128xf32> to vector<8x96xf32>
    %cst_152 = arith.constant 5.000000e-01 : f32
    %418 = vector.broadcast %cst_152 : f32 to vector<8x96xf32>
    %419 = arith.mulf %418, %417 : vector<8x96xf32>
    %420 = math.tanh %419 : vector<8x96xf32>
    %cst_153 = arith.constant 5.000000e-01 : f32
    %421 = vector.broadcast %cst_153 : f32 to vector<8x96xf32>
    %422 = arith.mulf %420, %421 : vector<8x96xf32>
    %cst_154 = arith.constant 5.000000e-01 : f32
    %423 = vector.broadcast %cst_154 : f32 to vector<8x96xf32>
    %424 = arith.addf %422, %423 : vector<8x96xf32>
    %425 = vector.extract_strided_slice %416 {offsets = [0, 96], sizes = [8, 32], strides = [1, 1]} : vector<8x128xf32> to vector<8x32xf32>
    %426 = math.tanh %425 : vector<8x32xf32>
    %427 = vector.extract_strided_slice %424 {offsets = [0, 32], sizes = [8, 32], strides = [1, 1]} : vector<8x96xf32> to vector<8x32xf32>
    %428 = arith.mulf %427, %408 : vector<8x32xf32>
    %429 = vector.extract_strided_slice %424 {offsets = [0, 0], sizes = [8, 32], strides = [1, 1]} : vector<8x96xf32> to vector<8x32xf32>
    %430 = arith.mulf %429, %426 : vector<8x32xf32>
    %431 = arith.addf %428, %430 : vector<8x32xf32>
    %432 = vector.extract_strided_slice %424 {offsets = [0, 64], sizes = [8, 32], strides = [1, 1]} : vector<8x96xf32> to vector<8x32xf32>
    %433 = math.tanh %431 : vector<8x32xf32>
    %434 = arith.mulf %432, %433 : vector<8x32xf32>
    %c8_i32_155 = arith.constant 8 : i32
    %c0_156 = arith.constant 0 : index
    %c0_157 = arith.constant 0 : index
    %435 = vector.load %arg2[%c0_156, %c0_157] : memref<8x32xf32, #tpu.memory_space<vmem>>, vector<8x32xf32>
    %436 = arith.mulf %434, %435 : vector<8x32xf32>
    %c0_158 = arith.constant 0 : index
    %c0_159 = arith.constant 0 : index
    %437 = vector.load %arg9[%c0_158, %c0_159] : memref<32x4xf32, #tpu.memory_space<vmem>>, vector<32x4xf32>
    %cst_160 = arith.constant dense<0.000000e+00> : vector<8x4xf32>
    %438 = tpu.matmul %436, %437, %cst_160 {dimension_numbers = #tpu.dot_dimension_numbers<[1], [0], [0], [1], [0, 0, 1, 1], [], []>} : vector<8x32xf32>, vector<32x4xf32>, vector<8x4xf32> -> vector<8x4xf32>
    %c0_161 = arith.constant 0 : index
    %c0_162 = arith.constant 0 : index
    %439 = vector.load %arg10[%c0_161, %c0_162] : memref<1x4xf32, #tpu.memory_space<vmem>>, vector<1x4xf32>
    %440 = vector.broadcast %439 : vector<1x4xf32> to vector<8x4xf32>
    %441 = arith.addf %438, %440 : vector<8x4xf32>
    %c0_163 = arith.constant 0 : index
    %c0_164 = arith.constant 0 : index
    %442 = vector.load %arg11[%c0_163, %c0_164] : memref<8x4xf32, #tpu.memory_space<vmem>>, vector<8x4xf32>
    tpu.vector_store %arg11[%c0_163, %c0_164], %441 {strides = array<i32>} : memref<8x4xf32, #tpu.memory_space<vmem>>, vector<8x4xf32>,
    return
  }
  func.func @transform_0(%arg0: i32) -> (i32, i32, i32) {
    %c0_i32 = arith.constant 0 : i32
    %c0_i32_0 = arith.constant 0 : i32
    %c0_i32_1 = arith.constant 0 : i32
    return %c0_i32, %arg0, %c0_i32_0 : i32, i32, i32
  }
  func.func @transform_1(%arg0: i32) -> (i32, i32) {
    %c0_i32 = arith.constant 0 : i32
    %c0_i32_0 = arith.constant 0 : i32
    return %arg0, %c0_i32 : i32, i32
  }
  func.func @transform_2(%arg0: i32) -> (i32, i32) {
    %c0_i32 = arith.constant 0 : i32
    %c0_i32_0 = arith.constant 0 : i32
    %c0_i32_1 = arith.constant 0 : i32
    return %c0_i32, %c0_i32_0 : i32, i32
  }
  func.func @transform_3(%arg0: i32) -> (i32, i32) {
    %c0_i32 = arith.constant 0 : i32
    %c0_i32_0 = arith.constant 0 : i32
    %c0_i32_1 = arith.constant 0 : i32
    return %c0_i32, %c0_i32_0 : i32, i32
  }
  func.func @transform_4(%arg0: i32) -> (i32, i32) {
    %c0_i32 = arith.constant 0 : i32
    %c0_i32_0 = arith.constant 0 : i32
    %c0_i32_1 = arith.constant 0 : i32
    return %c0_i32, %c0_i32_0 : i32, i32
  }
  func.func @transform_5(%arg0: i32) -> (i32, i32) {
    %c0_i32 = arith.constant 0 : i32
    %c0_i32_0 = arith.constant 0 : i32
    %c0_i32_1 = arith.constant 0 : i32
    return %c0_i32, %c0_i32_0 : i32, i32
  }
  func.func @transform_6(%arg0: i32) -> (i32, i32) {
    %c0_i32 = arith.constant 0 : i32
    %c0_i32_0 = arith.constant 0 : i32
    %c0_i32_1 = arith.constant 0 : i32
    return %c0_i32, %c0_i32_0 : i32, i32
  }
  func.func @transform_7(%arg0: i32) -> (i32, i32) {
    %c0_i32 = arith.constant 0 : i32
    %c0_i32_0 = arith.constant 0 : i32
    %c0_i32_1 = arith.constant 0 : i32
    return %c0_i32, %c0_i32_0 : i32, i32
  }
  func.func @transform_8(%arg0: i32) -> (i32, i32) {
    %c0_i32 = arith.constant 0 : i32
    %c0_i32_0 = arith.constant 0 : i32
    %c0_i32_1 = arith.constant 0 : i32
    return %c0_i32, %c0_i32_0 : i32, i32
  }
  func.func @transform_9(%arg0: i32) -> (i32, i32) {
    %c0_i32 = arith.constant 0 : i32
    %c0_i32_0 = arith.constant 0 : i32
    %c0_i32_1 = arith.constant 0 : i32
    return %c0_i32, %c0_i32_0 : i32, i32
  }
  func.func @transform_10(%arg0: i32) -> (i32, i32) {
    %c0_i32 = arith.constant 0 : i32
    %c0_i32_0 = arith.constant 0 : i32
    return %arg0, %c0_i32 : i32, i32
  }
}

</mosaic_0001>

<bundles_post_ra>
// kernel: lstm_mc_forward.1
= control target key start
LH: loop header
LB: loop body
LE: loop exit
PB: predicated region body
PF: predicated region fallthrough
CT: control target
= control target key end

     0   :  { %v1210_v2 = vmov 0   ;;  %v1211_v6 = vmov 0.0   ;;  %s1212_s26 = smov 32   ;;  %vm120_vm0 = vcmask 261120   ;;  %vm1070_vm1 = vcmask 31744   ;;  %s1556_s3 = inlined_call_operand.vmem [shape: f32[32,128], index: 3, kind: input, shape index: {}]   ;;  %s1557_s0 = inlined_call_operand.vmem [shape: f32[8,8,1], index: 0, kind: input, shape index: {}]   ;;  %s1558_s2 = inlined_call_operand.vmem [shape: f32[1,128], index: 2, kind: input, shape index: {}]   ;;  %s1559_s4 = inlined_call_operand.vmem [shape: f32[1,128], index: 4, kind: input, shape index: {}]   ;;  %s1560_s5 = inlined_call_operand.vmem [shape: f32[32,128], index: 5, kind: input, shape index: {}]   ;;  %s1561_s7 = inlined_call_operand.vmem [shape: f32[1,128], index: 7, kind: input, shape index: {}]   ;;  %s1562_s6 = inlined_call_operand.vmem [shape: f32[32,128], index: 6, kind: input, shape index: {}]   ;;  %s1563_s1 = inlined_call_operand.vmem [shape: f32[8,32], index: 1, kind: input, shape index: {}]   ;;  %s1564_s8 = inlined_call_operand.vmem [shape: f32[32,4], index: 8, kind: input, shape index: {}]   ;;  %s1565_s9 = inlined_call_operand.vmem [shape: f32[1,4], index: 9, kind: input, shape index: {}]   ;;  %s1566_s10 = inlined_call_operand.vmem [shape: f32[8,4], index: 10, kind: output, shape index: {}]  }
   0x1   :  { %v1272_v0 = vld [vmem:[%s1556_s3 + $0x18] sm:$0xff]  ;;  %v1277_v1 = vld [vmem:[%s1556_s3 + $0x10] sm:$0xff]  ;;  %1107 = vset.pattern.permute.xlu0 %v1210_v2  ;;  %1108 = vset.pattern.permute.xlu2 %v1210_v2  ;;  %v41_v3 = vld [vmem:[%s1557_s0] sm:$0xff] }
   0x2   :  { %136 = vmatpush.msra.mxu3 %v1272_v0  ;;  %188 = vmatpush.msra.mxu2 %v1272_v0  ;;  %v1287_v4 = vld [vmem:[%s1556_s3 + $0x8] sm:$0xff]  ;;  %v1294_v5 = vld [vmem:[%s1556_s3] sm:$0xff]  ;;  %v43_v47 = vld [vmem:[%s1557_s0 + $0x10] sm:$0xff] }
   0x3   :  { %51 = vperm.xlu0 %1107, %v41_v3   ;;  %1109 = vset.pattern.permute.xlu1 %v1210_v2  ;;  %v1324_v7 = vld [vmem:[%s1558_s2] ss:$0 sm:$0xff]  ;;  %s1213_s2 = smov 64   ;;  %v42_v27 = vld [vmem:[%s1557_s0 + $0x8] sm:$0xff]  ;;  %v44_v61 = vld [vmem:[%s1557_s0 + $0x18] sm:$0xff] }
   0x4   :  { %137 = vmatpush.msra.mxu3 %v1277_v1  ;;  %189 = vmatpush.msra.mxu2 %v1277_v1  ;;  %v1330_v10 = vld [vmem:[%s1559_s4] ss:$0 sm:$0xff] }
   0x5   :  { %347 = vmatpush.msra.mxu0 %v1272_v0  ;;  %400 = vmatpush.msra.mxu1 %v1272_v0 }
   0x6   :  { %138 = vmatpush.msra.mxu3 %v1287_v4  ;;  %190 = vmatpush.msra.mxu2 %v1287_v4 }
   0x7   :  { %348 = vmatpush.msra.mxu0 %v1277_v1  ;;  %401 = vmatpush.msra.mxu1 %v1277_v1 }
   0x8   :  { %139 = vmatpush.msra.mxu3 %v1294_v5  ;;  %191 = vmatpush.msra.mxu2 %v1294_v5 }
   0x9   :  { %140 = vmatmul.f32.vlgmr.msra.gmra.mxu3 %v1211_v6  ;;  %349 = vmatpush.msra.mxu0 %v1287_v4 }
   0xa   :  { %241 = vmatpush.msrb.mxu2 %v1272_v0  ;;  %294 = vmatpush.msrb.mxu3 %v1272_v0 }
   0xb   :  { %402 = vmatpush.msra.mxu1 %v1287_v4  ;;  %350 = vmatpush.msra.mxu0 %v1294_v5 }
   0xc   :  { %242 = vmatpush.msrb.mxu2 %v1277_v1  ;;  %295 = vmatpush.msrb.mxu3 %v1277_v1 }
   0xd   :  { %403 = vmatpush.msra.mxu1 %v1294_v5 }
   0xe   :  { %243 = vmatpush.msrb.mxu2 %v1287_v4  ;;  %296 = vmatpush.msrb.mxu3 %v1287_v4 }
  0x10   :  { %244 = vmatpush.msrb.mxu2 %v1294_v5  ;;  %297 = vmatpush.msrb.mxu3 %v1294_v5 }
  0x12   :  { %506 = vmatpush.msra.mxu3 %v1272_v0 }
  0x14   :  { %507 = vmatpush.msra.mxu3 %v1277_v1 }
  0x16   :  { %508 = vmatpush.msra.mxu3 %v1287_v4 }
  0x18   :  { %509 = vmatpush.msra.mxu3 %v1294_v5 }
  0x75   :  { %v52_v8 = vpop.permute.xlu0 %51 }
  0x76   :  { %v92_v9 = vmul.f32 %v1324_v7, %v52_v8 }
  0x78   :  { %v103_v11 = vadd.f32 %v1330_v10, %v92_v9 }
  0x8c   :  { %v141_v12 = vpop.f32.mrf.mxu3 }
  0x8d   :  { %v144_v13 = vadd.f32 %v141_v12, %v103_v11 }
  0x8f   :  { %1114 = vtanh.f32 %v144_v13  ;;  %v145_v15 = vmul.f32 0.5, %v144_v13 }
  0x91   :  { %1116 = vtanh.f32 %v145_v15 }
  0x95   :  { %v1115_v14 = vpop.eup %1114 }
  0x96   :  { %152 = vrot.lane.b32.xlu0 %v1115_v14, %s1212_s26 }
  0x97   :  { %v1117_v16 = vpop.eup %1116 }
  0x98   :  { %v147_v17 = vmul.f32 0.5, %v1117_v16 }
  0x9a   :  { %v148_v18 = vadd.f32 0.5, %v147_v17 }
  0x9c   :  { %v150_v21 = vmul.f32 0.0, %v148_v18 }
 0x108   :  { %v153_v19 = vpop.permute.xlu0 %152 }
 0x109   :  { %v155_v20 = vmul.f32 %v153_v19, %v148_v18 }
 0x10b   :  { %157 = vrot.lane.b32.xlu1 %v155_v20, %s1212_s26  ;;  %v45_v20 = vld [vmem:[%s1557_s0 + $0x20] sm:$0xff] }
 0x17d   :  { %v158_v22 = vpop.permute.xlu1 %157 }
 0x17e   :  { %v160_v23 = vadd.f32 %v158_v22, %v150_v21 }
 0x180   :  { %1118 = vtanh.f32 %v160_v23 }
 0x186   :  { %v1119_v24 = vpop.eup %1118 }
 0x187   :  { %163 = vrot.lane.b32.xlu1 %v1119_v24, %s1212_s26 }
 0x1f9   :  { %v164_v25 = vpop.permute.xlu1 %163 }
 0x1fa   :  { %v166_v26 = vmul.f32 %v164_v25, %v148_v18 }
 0x1fc   :  { %168 = vrot.lane.b32.xlu2 %v166_v26, %s1213_s2 }
 0x204   :  { %56 = vperm.xlu2 %1108, %v42_v27   ;;  %v546_v27 = vld [vmem:[%s1560_s5 + $0x18] sm:$0xff] }
 0x205   :  { %596 = vmatpush.msrb.mxu0 %v546_v27  ;;  %1099 = vmatpush.msrb.mxu1 %v546_v27 }
 0x256   :  { %v169_v28 = vpop.permute.xlu2 %168 }
 0x257   :  { %171 = vst.msk [vmem:[#allocation3] sm:$0xff] %vm120_vm0, %v169_v28  ;;  %1076 = vmatmul.msk.f32.vlgmr.msra.gmra.mxu2 %vm120_vm0, %v169_v28  ;;  %v545_v28 = vld [vmem:[%s1560_s5 + $0x10] sm:$0xff] }
 0x258   :  { %453 = vmatpush.msra.mxu2 %v1272_v0  ;;  %597 = vmatpush.msrb.mxu0 %v545_v28 }
 0x259   :  { %1100 = vmatpush.msrb.mxu1 %v545_v28 }
 0x25a   :  { %454 = vmatpush.msra.mxu2 %v1277_v1 }
 0x25c   :  { %455 = vmatpush.msra.mxu2 %v1287_v4 }
 0x25e   :  { %456 = vmatpush.msra.mxu2 %v1294_v5  ;;  %v57_v29 = vpop.permute.xlu2 %56 }
 0x25f   :  { %v93_v30 = vmul.f32 %v1324_v7, %v57_v29  ;;  %v544_v29 = vld [vmem:[%s1560_s5 + $0x8] sm:$0xff] }
 0x260   :  { %598 = vmatpush.msrb.mxu0 %v544_v29  ;;  %1101 = vmatpush.msrb.mxu1 %v544_v29  ;;  %v48_v29 = vld [vmem:[%s1557_s0 + $0x38] sm:$0xff] }
 0x261   :  { %v104_v31 = vadd.f32 %v1330_v10, %v93_v30  ;;  %v543_v30 = vld [vmem:[%s1560_s5] sm:$0xff] }
 0x262   :  { %599 = vmatpush.msrb.mxu0 %v543_v30  ;;  %1102 = vmatpush.msrb.mxu1 %v543_v30 }
 0x2da   :  { %v193_v32 = vpop.f32.mrf.mxu2 }
 0x2db   :  { %v196_v33 = vadd.f32 %v193_v32, %v104_v31  ;;  %v552_v32 = vld [vmem:[#allocation3] sm:$0xff] }
 0x2dd   :  { %1120 = vtanh.f32 %v196_v33  ;;  %v197_v35 = vmul.f32 0.5, %v196_v33 }
 0x2df   :  { %1122 = vtanh.f32 %v197_v35 }
 0x2e3   :  { %v1121_v34 = vpop.eup %1120 }
 0x2e4   :  { %204 = vrot.lane.b32.xlu0 %v1121_v34, %s1212_s26 }
 0x2e5   :  { %v1123_v36 = vpop.eup %1122 }
 0x2e6   :  { %v199_v37 = vmul.f32 0.5, %v1123_v36 }
 0x2e8   :  { %v200_v38 = vadd.f32 0.5, %v199_v37 }
 0x2ea   :  { %v202_v41 = vmul.f32 %v200_v38, %v160_v23 }
 0x356   :  { %v205_v39 = vpop.permute.xlu0 %204 }
 0x357   :  { %v207_v40 = vmul.f32 %v205_v39, %v200_v38 }
 0x359   :  { %209 = vrot.lane.b32.xlu1 %v207_v40, %s1212_s26 }
 0x361   :  { %61 = vperm.xlu1 %1109, %v43_v47  }
 0x3cb   :  { %v210_v42 = vpop.permute.xlu1 %209 }
 0x3cc   :  { %v212_v43 = vadd.f32 %v210_v42, %v202_v41 }
 0x3ce   :  { %1124 = vtanh.f32 %v212_v43 }
 0x3d3   :  { %v62_v49 = vpop.permute.xlu1 %61 }
 0x3d4   :  { %v1125_v44 = vpop.eup %1124  ;;  %v94_v50 = vmul.f32 %v1324_v7, %v62_v49 }
 0x3d5   :  { %215 = vrot.lane.b32.xlu2 %v1125_v44, %s1212_s26 }
 0x3d6   :  { %v105_v51 = vadd.f32 %v1330_v10, %v94_v50 }
 0x42f   :  { %v216_v45 = vpop.permute.xlu2 %215 }
 0x430   :  { %v218_v46 = vmul.f32 %v216_v45, %v200_v38 }
 0x432   :  { %220 = vrot.lane.b32.xlu0 %v218_v46, %s1213_s2 }
 0x4a4   :  { %v221_v48 = vpop.permute.xlu0 %220 }
 0x4a5   :  { %224 = vst.msk [vmem:[#allocation3 + $0x8] sm:$0xff] %vm120_vm0, %v221_v48  ;;  %1077 = vmatmul.msk.f32.vlgmr.msrb.gmra.mxu2 %vm120_vm0, %v221_v48  ;;  %v46_v48 = vld [vmem:[%s1557_s0 + $0x28] sm:$0xff] }
 0x4ac   :  { %v553_v33 = vld [vmem:[#allocation3 + $0x8] sm:$0xff] }
 0x528   :  { %v246_v52 = vpop.f32.mrf.mxu2 }
 0x529   :  { %v249_v53 = vadd.f32 %v246_v52, %v105_v51 }
 0x52b   :  { %1126 = vtanh.f32 %v249_v53  ;;  %v250_v55 = vmul.f32 0.5, %v249_v53 }
 0x52d   :  { %1128 = vtanh.f32 %v250_v55 }
 0x531   :  { %v1127_v54 = vpop.eup %1126 }
 0x532   :  { %257 = vrot.lane.b32.xlu2 %v1127_v54, %s1212_s26 }
 0x533   :  { %v1129_v56 = vpop.eup %1128 }
 0x534   :  { %v252_v57 = vmul.f32 0.5, %v1129_v56 }
 0x536   :  { %v253_v58 = vadd.f32 0.5, %v252_v57 }
 0x538   :  { %v255_v62 = vmul.f32 %v253_v58, %v212_v43 }
 0x58c   :  { %v258_v59 = vpop.permute.xlu2 %257 }
 0x58d   :  { %v260_v60 = vmul.f32 %v258_v59, %v253_v58 }
 0x58f   :  { %262 = vrot.lane.b32.xlu0 %v260_v60, %s1212_s26 }
 0x597   :  { %66 = vperm.xlu0 %1107, %v44_v61  }
 0x601   :  { %v263_v63 = vpop.permute.xlu0 %262 }
 0x602   :  { %v265_v0 = vadd.f32 %v263_v63, %v255_v62 }
 0x604   :  { %1130 = vtanh.f32 %v265_v0 }
 0x609   :  { %v67_v5 = vpop.permute.xlu0 %66 }
 0x60a   :  { %v1131_v1 = vpop.eup %1130  ;;  %v95_v8 = vmul.f32 %v1324_v7, %v67_v5  ;;  %v47_v5 = vld [vmem:[%s1557_s0 + $0x30] sm:$0xff] }
 0x60b   :  { %268 = vrot.lane.b32.xlu1 %v1131_v1, %s1212_s26 }
 0x60c   :  { %v106_v9 = vadd.f32 %v1330_v10, %v95_v8 }
 0x67d   :  { %v269_v2 = vpop.permute.xlu1 %268 }
 0x67e   :  { %v271_v3 = vmul.f32 %v269_v2, %v253_v58 }
 0x680   :  { %273 = vrot.lane.b32.xlu2 %v271_v3, %s1213_s2 }
 0x6da   :  { %v274_v4 = vpop.permute.xlu2 %273 }
 0x6db   :  { %277 = vst.msk [vmem:[#allocation3 + $0x10] sm:$0xff] %vm120_vm0, %v274_v4  ;;  %1078 = vmatmul.msk.f32.vlgmr.msrb.gmra.mxu3 %vm120_vm0, %v274_v4 }
 0x6e2   :  { %v554_v34 = vld [vmem:[#allocation3 + $0x10] sm:$0xff] }
 0x75e   :  { %v299_v11 = vpop.f32.mrf.mxu3 }
 0x75f   :  { %v302_v12 = vadd.f32 %v299_v11, %v106_v9 }
 0x761   :  { %1132 = vtanh.f32 %v302_v12  ;;  %v303_v14 = vmul.f32 0.5, %v302_v12 }
 0x763   :  { %1134 = vtanh.f32 %v303_v14 }
 0x767   :  { %v1133_v13 = vpop.eup %1132 }
 0x768   :  { %310 = vrot.lane.b32.xlu1 %v1133_v13, %s1212_s26 }
 0x769   :  { %v1135_v15 = vpop.eup %1134 }
 0x76a   :  { %v305_v16 = vmul.f32 0.5, %v1135_v15 }
 0x76c   :  { %v306_v17 = vadd.f32 0.5, %v305_v16 }
 0x76e   :  { %v308_v21 = vmul.f32 %v306_v17, %v265_v0 }
 0x7da   :  { %v311_v18 = vpop.permute.xlu1 %310 }
 0x7db   :  { %v313_v19 = vmul.f32 %v311_v18, %v306_v17 }
 0x7dd   :  { %315 = vrot.lane.b32.xlu2 %v313_v19, %s1212_s26 }
 0x7e5   :  { %71 = vperm.xlu2 %1108, %v45_v20  }
 0x837   :  { %v316_v22 = vpop.permute.xlu2 %315 }
 0x838   :  { %v318_v23 = vadd.f32 %v316_v22, %v308_v21 }
 0x83a   :  { %1136 = vtanh.f32 %v318_v23 }
 0x83f   :  { %v72_v36 = vpop.permute.xlu2 %71 }
 0x840   :  { %v1137_v24 = vpop.eup %1136  ;;  %v96_v37 = vmul.f32 %v1324_v7, %v72_v36 }
 0x841   :  { %321 = vrot.lane.b32.xlu0 %v1137_v24, %s1212_s26 }
 0x842   :  { %v107_v38 = vadd.f32 %v1330_v10, %v96_v37 }
 0x8b3   :  { %v322_v25 = vpop.permute.xlu0 %321 }
 0x8b4   :  { %v324_v26 = vmul.f32 %v322_v25, %v306_v17 }
 0x8b6   :  { %326 = vrot.lane.b32.xlu1 %v324_v26, %s1213_s2 }
 0x928   :  { %v327_v31 = vpop.permute.xlu1 %326 }
 0x929   :  { %330 = vst.msk [vmem:[#allocation3 + $0x18] sm:$0xff] %vm120_vm0, %v327_v31  ;;  %1079 = vmatmul.msk.f32.vlgmr.msra.gmra.mxu0 %vm120_vm0, %v327_v31 }
 0x930   :  { %v555_v35 = vld [vmem:[#allocation3 + $0x18] sm:$0xff] }
 0x931   :  { %1083 = vmatmul.msk.f32.vlgmr.msrb.gmra.mxu0 %vm120_vm0, %v552_v32 }
 0x939   :  { %1084 = vmatmul.msk.f32.gmra.mxu0 %vm120_vm0, %v553_v33 }
 0x941   :  { %1085 = vmatmul.msk.f32.gmra.mxu0 %vm120_vm0, %v554_v34 }
 0x949   :  { %1086 = vmatmul.msk.f32.gmra.mxu0 %vm120_vm0, %v555_v35 }
 0x9a6   :  { %v352_v39 = vpop.f32.mrf.mxu0 }
 0x9a7   :  { %v355_v40 = vadd.f32 %v352_v39, %v107_v38 }
 0x9a9   :  { %1138 = vtanh.f32 %v355_v40  ;;  %v356_v42 = vmul.f32 0.5, %v355_v40 }
 0x9ab   :  { %1140 = vtanh.f32 %v356_v42 }
 0x9af   :  { %v1139_v41 = vpop.eup %1138 }
 0x9b0   :  { %363 = vrot.lane.b32.xlu0 %v1139_v41, %s1212_s26 }
 0x9b1   :  { %v1141_v43 = vpop.eup %1140 }
 0x9b2   :  { %v358_v44 = vmul.f32 0.5, %v1141_v43 }
 0x9b4   :  { %v359_v45 = vadd.f32 0.5, %v358_v44 }
 0x9b6   :  { %v361_v49 = vmul.f32 %v359_v45, %v318_v23 }
 0xa22   :  { %v364_v46 = vpop.permute.xlu0 %363 }
 0xa23   :  { %v366_v47 = vmul.f32 %v364_v46, %v359_v45 }
 0xa25   :  { %368 = vrot.lane.b32.xlu1 %v366_v47, %s1212_s26 }
 0xa2d   :  { %76 = vperm.xlu1 %1109, %v46_v48  }
 0xa97   :  { %v369_v50 = vpop.permute.xlu1 %368 }
 0xa98   :  { %v371_v51 = vadd.f32 %v369_v50, %v361_v49 }
 0xa9a   :  { %1142 = vtanh.f32 %v371_v51 }
 0xa9f   :  { %v77_v57 = vpop.permute.xlu1 %76 }
 0xaa0   :  { %v1143_v52 = vpop.eup %1142  ;;  %v97_v58 = vmul.f32 %v1324_v7, %v77_v57  ;;  %v547_v57 = vld [vmem:[%s1562_s6] sm:$0xff] }
 0xaa1   :  { %374 = vrot.lane.b32.xlu2 %v1143_v52, %s1212_s26  ;;  %v1439_v52 = vld [vmem:[%s1562_s6 + $0x18] sm:$0xff] }
 0xaa2   :  { %v108_v59 = vadd.f32 %v1330_v10, %v97_v58  ;;  %706 = vmatpush.msrb.mxu2 %v1439_v52  ;;  %755 = vmatpush.msrb.mxu3 %v1439_v52 }
 0xafb   :  { %v375_v53 = vpop.permute.xlu2 %374 }
 0xafc   :  { %v377_v54 = vmul.f32 %v375_v53, %v359_v45  ;;  %v1444_v53 = vld [vmem:[%s1562_s6 + $0x10] sm:$0xff] }
 0xafd   :  { %707 = vmatpush.msrb.mxu2 %v1444_v53  ;;  %756 = vmatpush.msrb.mxu3 %v1444_v53 }
 0xafe   :  { %379 = vrot.lane.b32.xlu0 %v377_v54, %s1213_s2 }
 0xb70   :  { %v380_v55 = vpop.permute.xlu0 %379 }
 0xb71   :  { %383 = vst.msk [vmem:[#allocation3 + $0x20] sm:$0xff] %vm120_vm0, %v380_v55  ;;  %1080 = vmatmul.msk.f32.vlgmr.msra.gmra.mxu1 %vm120_vm0, %v380_v55 }
 0xb72   :  { %657 = vmatpush.msra.mxu1 %v1439_v52 }
 0xb74   :  { %658 = vmatpush.msra.mxu1 %v1444_v53 }
 0xb78   :  { %v556_v56 = vld [vmem:[#allocation3 + $0x20] sm:$0xff] }
 0xb79   :  { %1087 = vmatmul.msk.f32.gmra.mxu0 %vm120_vm0, %v556_v56  ;;  %v548_v56 = vld [vmem:[%s1562_s6 + $0x8] sm:$0xff] }
 0xb7a   :  { %659 = vmatpush.msra.mxu1 %v548_v56  ;;  %708 = vmatpush.msrb.mxu2 %v548_v56 }
 0xb7b   :  { %757 = vmatpush.msrb.mxu3 %v548_v56 }
 0xb7c   :  { %660 = vmatpush.msra.mxu1 %v547_v57  ;;  %709 = vmatpush.msrb.mxu2 %v547_v57 }
 0xb7d   :  { %758 = vmatpush.msrb.mxu3 %v547_v57 }
 0xbee   :  { %v405_v60 = vpop.f32.mrf.mxu1 }
 0xbef   :  { %v408_v61 = vadd.f32 %v405_v60, %v108_v59 }
 0xbf1   :  { %1144 = vtanh.f32 %v408_v61  ;;  %v409_v63 = vmul.f32 0.5, %v408_v61 }
 0xbf3   :  { %1146 = vtanh.f32 %v409_v63  ;;  %v1479_v63 = vld [vmem:[%s1561_s7] ss:$0 sm:$0xff] }
 0xbf7   :  { %v1145_v62 = vpop.eup %1144 }
 0xbf8   :  { %416 = vrot.lane.b32.xlu2 %v1145_v62, %s1212_s26 }
 0xbf9   :  { %v1147_v0 = vpop.eup %1146 }
 0xbfa   :  { %v411_v1 = vmul.f32 0.5, %v1147_v0  ;;  %v601_v0 = vpop.f32.mrf.mxu0 }
 0xbfc   :  { %v412_v2 = vadd.f32 0.5, %v411_v1 }
 0xbfe   :  { %v414_v8 = vmul.f32 %v412_v2, %v371_v51 }
 0xc52   :  { %v417_v3 = vpop.permute.xlu2 %416 }
 0xc53   :  { %v419_v4 = vmul.f32 %v417_v3, %v412_v2 }
 0xc55   :  { %421 = vrot.lane.b32.xlu0 %v419_v4, %s1212_s26 }
 0xc5d   :  { %81 = vperm.xlu0 %1107, %v47_v5  }
 0xcc7   :  { %v422_v9 = vpop.permute.xlu0 %421 }
 0xcc8   :  { %v424_v11 = vadd.f32 %v422_v9, %v414_v8 }
 0xcca   :  { %1148 = vtanh.f32 %v424_v11 }
 0xccf   :  { %v82_v17 = vpop.permute.xlu0 %81 }
 0xcd0   :  { %v1149_v12 = vpop.eup %1148  ;;  %v98_v18 = vmul.f32 %v1324_v7, %v82_v17 }
 0xcd1   :  { %427 = vrot.lane.b32.xlu1 %v1149_v12, %s1212_s26 }
 0xcd2   :  { %v109_v19 = vadd.f32 %v1330_v10, %v98_v18 }
 0xd43   :  { %v428_v13 = vpop.permute.xlu1 %427 }
 0xd44   :  { %v430_v14 = vmul.f32 %v428_v13, %v412_v2 }
 0xd46   :  { %432 = vrot.lane.b32.xlu2 %v430_v14, %s1213_s2 }
 0xda0   :  { %v433_v15 = vpop.permute.xlu2 %432 }
 0xda1   :  { %436 = vst.msk [vmem:[#allocation3 + $0x28] sm:$0xff] %vm120_vm0, %v433_v15  ;;  %1081 = vmatmul.msk.f32.vlgmr.msra.gmra.mxu2 %vm120_vm0, %v433_v15 }
 0xda2   :  { %853 = vmatpush.msra.mxu2 %v1439_v52 }
 0xda4   :  { %854 = vmatpush.msra.mxu2 %v1444_v53 }
 0xda6   :  { %855 = vmatpush.msra.mxu2 %v548_v56 }
 0xda8   :  { %v557_v16 = vld [vmem:[#allocation3 + $0x28] sm:$0xff]  ;;  %856 = vmatpush.msra.mxu2 %v547_v57 }
 0xda9   :  { %1088 = vmatmul.msk.f32.vlgmr.msrb.gmra.mxu1 %vm120_vm0, %v557_v16 }
 0xdaa   :  { %804 = vmatpush.msrb.mxu1 %v1439_v52 }
 0xdac   :  { %805 = vmatpush.msrb.mxu1 %v1444_v53 }
 0xdae   :  { %806 = vmatpush.msrb.mxu1 %v548_v56 }
 0xdb0   :  { %807 = vmatpush.msrb.mxu1 %v547_v57 }
 0xe24   :  { %v458_v20 = vpop.f32.mrf.mxu2 }
 0xe25   :  { %v461_v21 = vadd.f32 %v458_v20, %v109_v19  ;;  %v604_v20 = vpop.f32.mrf.mxu0 }
 0xe26   :  { %v1470_v60 = vpop.f32.mrf.mxu1 }
 0xe27   :  { %1150 = vtanh.f32 %v461_v21  ;;  %v462_v23 = vmul.f32 0.5, %v461_v21  ;;  %v629_v21 = vadd.f32 %v1479_v63, %v604_v20 }
 0xe29   :  { %1152 = vtanh.f32 %v462_v23 }
 0xe2d   :  { %v1151_v22 = vpop.eup %1150 }
 0xe2e   :  { %469 = vrot.lane.b32.xlu1 %v1151_v22, %s1212_s26 }
 0xe2f   :  { %v1153_v24 = vpop.eup %1152 }
 0xe30   :  { %v464_v25 = vmul.f32 0.5, %v1153_v24 }
 0xe32   :  { %v465_v26 = vadd.f32 0.5, %v464_v25 }
 0xe34   :  { %v467_v30 = vmul.f32 %v465_v26, %v424_v11 }
 0xea0   :  { %v470_v27 = vpop.permute.xlu1 %469 }
 0xea1   :  { %v472_v28 = vmul.f32 %v470_v27, %v465_v26 }
 0xea3   :  { %474 = vrot.lane.b32.xlu2 %v472_v28, %s1212_s26 }
 0xeab   :  { %86 = vperm.xlu2 %1108, %v48_v29  }
 0xefd   :  { %v475_v31 = vpop.permute.xlu2 %474 }
 0xefe   :  { %v477_v32 = vadd.f32 %v475_v31, %v467_v30 }
 0xf00   :  { %1154 = vtanh.f32 %v477_v32 }
 0xf05   :  { %v87_v38 = vpop.permute.xlu2 %86 }
 0xf06   :  { %v1155_v33 = vpop.eup %1154  ;;  %v99_v39 = vmul.f32 %v1324_v7, %v87_v38  ;;  %v607_v38 = vpop.f32.mrf.mxu0 }
 0xf07   :  { %480 = vrot.lane.b32.xlu0 %v1155_v33, %s1212_s26 }
 0xf08   :  { %v110_v40 = vadd.f32 %v1330_v10, %v99_v39  ;;  %v630_v39 = vadd.f32 %v1479_v63, %v607_v38 }
 0xf79   :  { %v481_v34 = vpop.permute.xlu0 %480 }
 0xf7a   :  { %v483_v35 = vmul.f32 %v481_v34, %v465_v26 }
 0xf7c   :  { %485 = vrot.lane.b32.xlu1 %v483_v35, %s1213_s2 }
 0xfee   :  { %v486_v36 = vpop.permute.xlu1 %485 }
 0xfef   :  { %489 = vst.msk [vmem:[#allocation3 + $0x30] sm:$0xff] %vm120_vm0, %v486_v36  ;;  %1082 = vmatmul.msk.f32.vlgmr.msra.gmra.mxu3 %vm120_vm0, %v486_v36 }
 0xff0   :  { %902 = vmatpush.msra.mxu3 %v1439_v52 }
 0xff2   :  { %903 = vmatpush.msra.mxu3 %v1444_v53 }
 0xff4   :  { %904 = vmatpush.msra.mxu3 %v548_v56 }
 0xff6   :  { %v558_v37 = vld [vmem:[#allocation3 + $0x30] sm:$0xff]  ;;  %905 = vmatpush.msra.mxu3 %v547_v57 }
 0xff7   :  { %1089 = vmatmul.msk.f32.gmra.mxu1 %vm120_vm0, %v558_v37 }
0x1072   :  { %v511_v41 = vpop.f32.mrf.mxu3 }
0x1073   :  { %v514_v42 = vadd.f32 %v511_v41, %v110_v40 }
0x1074   :  { %v1472_v61 = vpop.f32.mrf.mxu1 }
0x1075   :  { %1156 = vtanh.f32 %v514_v42  ;;  %v515_v44 = vmul.f32 0.5, %v514_v42 }
0x1077   :  { %1158 = vtanh.f32 %v515_v44 }
0x107b   :  { %v1157_v43 = vpop.eup %1156 }
0x107c   :  { %522 = vrot.lane.b32.xlu0 %v1157_v43, %s1212_s26 }
0x107d   :  { %v1159_v45 = vpop.eup %1158 }
0x107e   :  { %v517_v46 = vmul.f32 0.5, %v1159_v45 }
0x1080   :  { %v518_v47 = vadd.f32 0.5, %v517_v46 }
0x1082   :  { %v520_v50 = vmul.f32 %v518_v47, %v477_v32 }
0x10ee   :  { %v523_v48 = vpop.permute.xlu0 %522 }
0x10ef   :  { %v525_v49 = vmul.f32 %v523_v48, %v518_v47 }
0x10f1   :  { %527 = vrot.lane.b32.xlu1 %v525_v49, %s1212_s26 }
0x1163   :  { %v528_v51 = vpop.permute.xlu1 %527 }
0x1164   :  { %v530_v7 = vadd.f32 %v528_v51, %v520_v50 }
0x1166   :  { %1160 = vtanh.f32 %v530_v7 }
0x116c   :  { %v1161_v10 = vpop.eup %1160 }
0x116d   :  { %533 = vrot.lane.b32.xlu2 %v1161_v10, %s1212_s26 }
0x11c7   :  { %v534_v54 = vpop.permute.xlu2 %533 }
0x11c8   :  { %v536_v55 = vmul.f32 %v534_v54, %v518_v47  ;;  %v610_v54 = vpop.f32.mrf.mxu0 }
0x11ca   :  { %538 = vrot.lane.b32.xlu0 %v536_v55, %s1213_s2  ;;  %v631_v55 = vadd.f32 %v1479_v63, %v610_v54 }
0x123c   :  { %v539_v58 = vpop.permute.xlu0 %538 }
0x123d   :  { %542 = vst.msk [vmem:[#allocation3 + $0x38] sm:$0xff] %vm120_vm0, %v539_v58 }
0x1244   :  { %v559_v59 = vld [vmem:[#allocation3 + $0x38] sm:$0xff] }
0x1245   :  { %1090 = vmatmul.msk.f32.gmra.mxu1 %vm120_vm0, %v559_v59 }
0x124d   :  { %661 = vmatmul.f32.vlgmr.msra.gmra.mxu1 %v1211_v6  ;;  %v628_v6 = vadd.f32 %v1479_v63, %v601_v0 }
0x124e   :  { %951 = vmatpush.msra.mxu1 %v1439_v52 }
0x1250   :  { %952 = vmatpush.msra.mxu1 %v1444_v53 }
0x1252   :  { %953 = vmatpush.msra.mxu1 %v548_v56 }
0x1254   :  { %954 = vmatpush.msra.mxu1 %v547_v57 }
0x12c2   :  { %v1474_v62 = vpop.f32.mrf.mxu1 }
0x12ca   :  { %v662_v1 = vpop.f32.mrf.mxu1 }
0x12cb   :  { %v665_v2 = vadd.f32 %v662_v1, %v628_v6 }
0x12cd   :  { %1162 = vtanh.f32 %v665_v2  ;;  %v666_v4 = vmul.f32 0.5, %v665_v2 }
0x12cf   :  { %1164 = vtanh.f32 %v666_v4 }
0x12d3   :  { %v1163_v3 = vpop.eup %1162 }
0x12d4   :  { %673 = vrot.lane.b32.xlu1 %v1163_v3, %s1212_s26 }
0x12d5   :  { %v1165_v5 = vpop.eup %1164 }
0x12d6   :  { %v668_v8 = vmul.f32 0.5, %v1165_v5 }
0x12d8   :  { %v669_v9 = vadd.f32 0.5, %v668_v8 }
0x12da   :  { %v671_v13 = vmul.f32 0.0, %v669_v9 }
0x1346   :  { %v674_v11 = vpop.permute.xlu1 %673 }
0x1347   :  { %v676_v12 = vmul.f32 %v674_v11, %v669_v9 }
0x1349   :  { %678 = vrot.lane.b32.xlu2 %v676_v12, %s1212_s26 }
0x13a3   :  { %v679_v14 = vpop.permute.xlu2 %678 }
0x13a4   :  { %v681_v15 = vadd.f32 %v679_v14, %v671_v13  ;;  %v613_v14 = vpop.f32.mrf.mxu0 }
0x13a6   :  { %1166 = vtanh.f32 %v681_v15 }
0x13ac   :  { %v1167_v16 = vpop.eup %1166 }
0x13ad   :  { %684 = vrot.lane.b32.xlu0 %v1167_v16, %s1212_s26 }
0x141f   :  { %v685_v17 = vpop.permute.xlu0 %684 }
0x1420   :  { %v687_v18 = vmul.f32 %v685_v17, %v669_v9 }
0x1422   :  { %690 = vrot.lane.b32.xlu1 %v687_v18, %s1213_s2 }
0x1494   :  { %v691_v19 = vpop.permute.xlu1 %690 }
0x1495   :  { %1091 = vmatmul.msk.f32.vlgmr.msrb.gmra.mxu2 %vm120_vm0, %v691_v19 }
0x1496   :  { %1000 = vmatpush.msrb.mxu2 %v1439_v52 }
0x1498   :  { %1001 = vmatpush.msrb.mxu2 %v1444_v53 }
0x149a   :  { %1002 = vmatpush.msrb.mxu2 %v548_v56 }
0x149c   :  { %1003 = vmatpush.msrb.mxu2 %v547_v57 }
0x1518   :  { %v711_v22 = vpop.f32.mrf.mxu2 }
0x1519   :  { %v714_v23 = vadd.f32 %v711_v22, %v629_v21 }
0x151b   :  { %1168 = vtanh.f32 %v714_v23  ;;  %v715_v25 = vmul.f32 0.5, %v714_v23 }
0x151d   :  { %1170 = vtanh.f32 %v715_v25 }
0x1521   :  { %v1169_v24 = vpop.eup %1168 }
0x1522   :  { %722 = vrot.lane.b32.xlu2 %v1169_v24, %s1212_s26 }
0x1523   :  { %v1171_v26 = vpop.eup %1170 }
0x1524   :  { %v717_v27 = vmul.f32 0.5, %v1171_v26 }
0x1526   :  { %v718_v28 = vadd.f32 0.5, %v717_v27 }
0x1528   :  { %v720_v31 = vmul.f32 %v718_v28, %v681_v15  ;;  %v632_v15 = vadd.f32 %v1479_v63, %v613_v14  ;;  %v1031_v14 = vld [vmem:[%s1563_s1] sm:$0xff] }
0x157c   :  { %v723_v29 = vpop.permute.xlu2 %722 }
0x157d   :  { %v725_v30 = vmul.f32 %v723_v29, %v718_v28 }
0x157f   :  { %727 = vrot.lane.b32.xlu0 %v725_v30, %s1212_s26 }
0x15f1   :  { %v728_v32 = vpop.permute.xlu0 %727 }
0x15f2   :  { %v730_v33 = vadd.f32 %v728_v32, %v720_v31  ;;  %v633_v32 = vadd.f32 %v1479_v63, %v1470_v60 }
0x15f4   :  { %1172 = vtanh.f32 %v730_v33 }
0x15fa   :  { %v1173_v34 = vpop.eup %1172 }
0x15fb   :  { %733 = vrot.lane.b32.xlu1 %v1173_v34, %s1212_s26 }
0x166d   :  { %v734_v35 = vpop.permute.xlu1 %733 }
0x166e   :  { %v736_v36 = vmul.f32 %v734_v35, %v718_v28 }
0x1670   :  { %739 = vrot.lane.b32.xlu2 %v736_v36, %s1213_s2 }
0x16ca   :  { %v740_v37 = vpop.permute.xlu2 %739 }
0x16cb   :  { %1092 = vmatmul.msk.f32.vlgmr.msrb.gmra.mxu3 %vm120_vm0, %v740_v37 }
0x174e   :  { %v760_v40 = vpop.f32.mrf.mxu3 }
0x174f   :  { %v763_v41 = vadd.f32 %v760_v40, %v630_v39 }
0x1751   :  { %1174 = vtanh.f32 %v763_v41  ;;  %v764_v43 = vmul.f32 0.5, %v763_v41 }
0x1753   :  { %1176 = vtanh.f32 %v764_v43 }
0x1757   :  { %v1175_v42 = vpop.eup %1174 }
0x1758   :  { %771 = vrot.lane.b32.xlu0 %v1175_v42, %s1212_s26 }
0x1759   :  { %v1177_v44 = vpop.eup %1176 }
0x175a   :  { %v766_v45 = vmul.f32 0.5, %v1177_v44 }
0x175c   :  { %v767_v46 = vadd.f32 0.5, %v766_v45 }
0x175e   :  { %v769_v49 = vmul.f32 %v767_v46, %v730_v33 }
0x17ca   :  { %v772_v47 = vpop.permute.xlu0 %771 }
0x17cb   :  { %v774_v48 = vmul.f32 %v772_v47, %v767_v46 }
0x17cd   :  { %776 = vrot.lane.b32.xlu1 %v774_v48, %s1212_s26  ;;  %v634_v48 = vadd.f32 %v1479_v63, %v1472_v61 }
0x183f   :  { %v777_v50 = vpop.permute.xlu1 %776 }
0x1840   :  { %v779_v51 = vadd.f32 %v777_v50, %v769_v49 }
0x1842   :  { %1178 = vtanh.f32 %v779_v51 }
0x1848   :  { %v1179_v7 = vpop.eup %1178 }
0x1849   :  { %782 = vrot.lane.b32.xlu2 %v1179_v7, %s1212_s26 }
0x18a3   :  { %v783_v10 = vpop.permute.xlu2 %782 }
0x18a4   :  { %v785_v52 = vmul.f32 %v783_v10, %v767_v46 }
0x18a6   :  { %788 = vrot.lane.b32.xlu0 %v785_v52, %s1213_s2 }
0x1918   :  { %v789_v53 = vpop.permute.xlu0 %788 }
0x1919   :  { %1093 = vmatmul.msk.f32.vlgmr.msrb.gmra.mxu1 %vm120_vm0, %v789_v53 }
0x1996   :  { %v809_v56 = vpop.f32.mrf.mxu1 }
0x1997   :  { %v812_v57 = vadd.f32 %v809_v56, %v631_v55 }
0x1999   :  { %1180 = vtanh.f32 %v812_v57  ;;  %v813_v59 = vmul.f32 0.5, %v812_v57 }
0x199b   :  { %1182 = vtanh.f32 %v813_v59 }
0x199f   :  { %v1181_v58 = vpop.eup %1180 }
0x19a0   :  { %820 = vrot.lane.b32.xlu1 %v1181_v58, %s1212_s26 }
0x19a1   :  { %v1183_v0 = vpop.eup %1182 }
0x19a2   :  { %v815_v6 = vmul.f32 0.5, %v1183_v0 }
0x19a4   :  { %v816_v1 = vadd.f32 0.5, %v815_v6 }
0x19a6   :  { %v818_v4 = vmul.f32 %v816_v1, %v779_v51 }
0x1a12   :  { %v821_v2 = vpop.permute.xlu1 %820 }
0x1a13   :  { %v823_v3 = vmul.f32 %v821_v2, %v816_v1 }
0x1a15   :  { %825 = vrot.lane.b32.xlu2 %v823_v3, %s1212_s26 }
0x1a6f   :  { %v826_v5 = vpop.permute.xlu2 %825 }
0x1a70   :  { %v828_v8 = vadd.f32 %v826_v5, %v818_v4 }
0x1a72   :  { %1184 = vtanh.f32 %v828_v8 }
0x1a78   :  { %v1185_v9 = vpop.eup %1184 }
0x1a79   :  { %831 = vrot.lane.b32.xlu0 %v1185_v9, %s1212_s26 }
0x1aeb   :  { %v832_v11 = vpop.permute.xlu0 %831 }
0x1aec   :  { %v834_v12 = vmul.f32 %v832_v11, %v816_v1  ;;  %v635_v1 = vadd.f32 %v1479_v63, %v1474_v62 }
0x1aee   :  { %837 = vrot.lane.b32.xlu1 %v834_v12, %s1213_s2 }
0x1b60   :  { %v838_v13 = vpop.permute.xlu1 %837 }
0x1b61   :  { %1094 = vmatmul.msk.f32.vlgmr.msra.gmra.mxu2 %vm120_vm0, %v838_v13 }
0x1be4   :  { %v858_v16 = vpop.f32.mrf.mxu2 }
0x1be5   :  { %v861_v17 = vadd.f32 %v858_v16, %v632_v15 }
0x1be7   :  { %1186 = vtanh.f32 %v861_v17  ;;  %v862_v19 = vmul.f32 0.5, %v861_v17  ;;  %v1040_v17 = vld [vmem:[%s1564_s8 + $0x18] sm:$0xff] }
0x1be8   :  { %1062 = vmatpush.msrb.mxu3 %v1040_v17 }
0x1be9   :  { %1188 = vtanh.f32 %v862_v19  ;;  %v1038_v19 = vld [vmem:[%s1564_s8 + $0x8] sm:$0xff] }
0x1bed   :  { %v1187_v18 = vpop.eup %1186 }
0x1bee   :  { %869 = vrot.lane.b32.xlu2 %v1187_v18, %s1212_s26  ;;  %v1039_v18 = vld [vmem:[%s1564_s8 + $0x10] sm:$0xff] }
0x1bef   :  { %v1189_v20 = vpop.eup %1188  ;;  %1063 = vmatpush.msrb.mxu3 %v1039_v18 }
0x1bf0   :  { %v864_v21 = vmul.f32 0.5, %v1189_v20  ;;  %v1037_v20 = vld [vmem:[%s1564_s8] sm:$0xff] }
0x1bf1   :  { %1064 = vmatpush.msrb.mxu3 %v1038_v19 }
0x1bf2   :  { %v865_v22 = vadd.f32 0.5, %v864_v21 }
0x1bf3   :  { %1065 = vmatpush.msrb.mxu3 %v1037_v20 }
0x1bf4   :  { %v867_v25 = vmul.f32 %v865_v22, %v828_v8 }
0x1c48   :  { %v870_v23 = vpop.permute.xlu2 %869 }
0x1c49   :  { %v872_v24 = vmul.f32 %v870_v23, %v865_v22 }
0x1c4b   :  { %874 = vrot.lane.b32.xlu0 %v872_v24, %s1212_s26 }
0x1cbd   :  { %v875_v26 = vpop.permute.xlu0 %874 }
0x1cbe   :  { %v877_v27 = vadd.f32 %v875_v26, %v867_v25  ;;  %v1113_v26 = vld [vmem:[%s1565_s9] ss:$0 sm:$0xff] }
0x1cc0   :  { %1190 = vtanh.f32 %v877_v27 }
0x1cc6   :  { %v1191_v28 = vpop.eup %1190 }
0x1cc7   :  { %880 = vrot.lane.b32.xlu1 %v1191_v28, %s1212_s26 }
0x1d39   :  { %v881_v29 = vpop.permute.xlu1 %880 }
0x1d3a   :  { %v883_v30 = vmul.f32 %v881_v29, %v865_v22 }
0x1d3c   :  { %886 = vrot.lane.b32.xlu2 %v883_v30, %s1213_s2 }
0x1d96   :  { %v887_v31 = vpop.permute.xlu2 %886 }
0x1d97   :  { %1095 = vmatmul.msk.f32.vlgmr.msra.gmra.mxu3 %vm120_vm0, %v887_v31 }
0x1e1a   :  { %v907_v33 = vpop.f32.mrf.mxu3 }
0x1e1b   :  { %v910_v34 = vadd.f32 %v907_v33, %v633_v32 }
0x1e1d   :  { %1192 = vtanh.f32 %v910_v34  ;;  %v911_v36 = vmul.f32 0.5, %v910_v34 }
0x1e1f   :  { %1194 = vtanh.f32 %v911_v36 }
0x1e23   :  { %v1193_v35 = vpop.eup %1192 }
0x1e24   :  { %918 = vrot.lane.b32.xlu0 %v1193_v35, %s1212_s26 }
0x1e25   :  { %v1195_v37 = vpop.eup %1194 }
0x1e26   :  { %v913_v38 = vmul.f32 0.5, %v1195_v37 }
0x1e28   :  { %v914_v39 = vadd.f32 0.5, %v913_v38 }
0x1e2a   :  { %v916_v42 = vmul.f32 %v914_v39, %v877_v27 }
0x1e96   :  { %v919_v40 = vpop.permute.xlu0 %918 }
0x1e97   :  { %v921_v41 = vmul.f32 %v919_v40, %v914_v39 }
0x1e99   :  { %923 = vrot.lane.b32.xlu1 %v921_v41, %s1212_s26 }
0x1f0b   :  { %v924_v43 = vpop.permute.xlu1 %923 }
0x1f0c   :  { %v926_v44 = vadd.f32 %v924_v43, %v916_v42 }
0x1f0e   :  { %1196 = vtanh.f32 %v926_v44 }
0x1f14   :  { %v1197_v60 = vpop.eup %1196 }
0x1f15   :  { %929 = vrot.lane.b32.xlu2 %v1197_v60, %s1212_s26 }
0x1f6f   :  { %v930_v45 = vpop.permute.xlu2 %929 }
0x1f70   :  { %v932_v46 = vmul.f32 %v930_v45, %v914_v39 }
0x1f72   :  { %935 = vrot.lane.b32.xlu0 %v932_v46, %s1213_s2 }
0x1fe4   :  { %v936_v47 = vpop.permute.xlu0 %935 }
0x1fe5   :  { %1096 = vmatmul.msk.f32.vlgmr.msra.gmra.mxu1 %vm120_vm0, %v936_v47 }
0x2062   :  { %v956_v49 = vpop.f32.mrf.mxu1 }
0x2063   :  { %v959_v50 = vadd.f32 %v956_v49, %v634_v48 }
0x2065   :  { %1198 = vtanh.f32 %v959_v50  ;;  %v960_v7 = vmul.f32 0.5, %v959_v50 }
0x2067   :  { %1200 = vtanh.f32 %v960_v7 }
0x206b   :  { %v1199_v51 = vpop.eup %1198 }
0x206c   :  { %967 = vrot.lane.b32.xlu1 %v1199_v51, %s1212_s26 }
0x206d   :  { %v1201_v10 = vpop.eup %1200 }
0x206e   :  { %v962_v52 = vmul.f32 0.5, %v1201_v10 }
0x2070   :  { %v963_v53 = vadd.f32 0.5, %v962_v52 }
0x2072   :  { %v965_v56 = vmul.f32 %v963_v53, %v926_v44 }
0x20de   :  { %v968_v54 = vpop.permute.xlu1 %967 }
0x20df   :  { %v970_v55 = vmul.f32 %v968_v54, %v963_v53 }
0x20e1   :  { %972 = vrot.lane.b32.xlu2 %v970_v55, %s1212_s26 }
0x213b   :  { %v973_v57 = vpop.permute.xlu2 %972 }
0x213c   :  { %v975_v58 = vadd.f32 %v973_v57, %v965_v56 }
0x213e   :  { %1202 = vtanh.f32 %v975_v58 }
0x2144   :  { %v1203_v61 = vpop.eup %1202 }
0x2145   :  { %978 = vrot.lane.b32.xlu0 %v1203_v61, %s1212_s26 }
0x21b7   :  { %v979_v59 = vpop.permute.xlu0 %978 }
0x21b8   :  { %v981_v0 = vmul.f32 %v979_v59, %v963_v53 }
0x21ba   :  { %984 = vrot.lane.b32.xlu1 %v981_v0, %s1213_s2 }
0x222c   :  { %v985_v6 = vpop.permute.xlu1 %984 }
0x222d   :  { %1097 = vmatmul.msk.f32.vlgmr.msrb.gmra.mxu2 %vm120_vm0, %v985_v6 }
0x22b0   :  { %v1005_v2 = vpop.f32.mrf.mxu2 }
0x22b1   :  { %v1008_v3 = vadd.f32 %v1005_v2, %v635_v1 }
0x22b3   :  { %1204 = vtanh.f32 %v1008_v3  ;;  %v1009_v5 = vmul.f32 0.5, %v1008_v3 }
0x22b5   :  { %1206 = vtanh.f32 %v1009_v5 }
0x22b9   :  { %v1205_v4 = vpop.eup %1204 }
0x22ba   :  { %1016 = vrot.lane.b32.xlu2 %v1205_v4, %s1212_s26 }
0x22bb   :  { %v1207_v8 = vpop.eup %1206 }
0x22bc   :  { %v1011_v9 = vmul.f32 0.5, %v1207_v8 }
0x22be   :  { %v1012_v11 = vadd.f32 0.5, %v1011_v9 }
0x22c0   :  { %v1014_v62 = vmul.f32 %v1012_v11, %v975_v58 }
0x22c2   :  { %1033 = vrot.lane.b32.xlu2 %v1031_v14, %s1213_s2 }
0x2314   :  { %v1017_v12 = vpop.permute.xlu2 %1016 }
0x2315   :  { %v1019_v13 = vmul.f32 %v1017_v12, %v1012_v11 }
0x2317   :  { %1021 = vrot.lane.b32.xlu0 %v1019_v13, %s1212_s26 }
0x231c   :  { %v1034_v22 = vpop.permute.xlu2 %1033 }
0x2389   :  { %v1022_v63 = vpop.permute.xlu0 %1021 }
0x238a   :  { %v1024_v15 = vadd.f32 %v1022_v63, %v1014_v62 }
0x238c   :  { %1208 = vtanh.f32 %v1024_v15 }
0x2392   :  { %v1209_v16 = vpop.eup %1208 }
0x2393   :  { %1027 = vrot.lane.b32.xlu1 %v1209_v16, %s1212_s26 }
0x2405   :  { %v1028_v21 = vpop.permute.xlu1 %1027 }
0x2406   :  { %v1030_v23 = vmul.f32 %v1028_v21, %v1012_v11 }
0x2408   :  { %v1036_v24 = vmul.f32 %v1034_v22, %v1030_v23 }
0x240a   :  { %1046 = vrot.lane.b32.xlu0 %v1036_v24, %s1213_s2 }
0x247c   :  { %v1047_v25 = vpop.permute.xlu0 %1046 }
0x247d   :  { %1098 = vmatmul.msk.f32.vlgmr.msrb.gmra.mxu3 %vm120_vm0, %v1047_v25 }
0x2500   :  { %v1067_v27 = vpop.f32.mrf.mxu3 }
0x2501   :  { %v1068_v28 = vadd.f32 %v1113_v26, %v1067_v27 }
0x2503   :  { %1071 = vst.msk [vmem:[%s1566_s10] sm:$0xff] %vm1070_vm1, %v1068_v28 }

</bundles_post_ra>
